<compile_context>
chip_gen: v5e
topology: v5e:2x2
jax: 0.10.0
libtpu: 0.0.40
codegen_flags: <defaults>
</compile_context>

<pallas_src>
import math
from functools import partial

import jax
import jax.numpy as jnp
from jax.experimental import pallas as pl
from jax.experimental.pallas import tpu as pltpu

VOCAB = 16


# --------------------------- packed-parameter layout ----------------------- #
def _offsets(V, H):
    """Row offsets of each section in the packed (rows, 4H) parameter buffer.
    Every section starts on an 8-sublane boundary."""
    assert V % 8 == 0 and H % 8 == 0
    off = {}
    r = 0
    off["e1"] = r;    r += V      # emb @ W_ih1.T + (b_ih1+b_hh1)         (V, G)
    off["whh1"] = r;  r += H      # W_hh1.T                               (H, G)
    off["whh2"] = r;  r += H      # W_hh2.T                               (H, G)
    off["wih2"] = r;  r += H      # W_ih2.T                               (H, G)
    off["b2"] = r;    r += 8      # b_ih2 + b_hh2 (row 0)                 (1, G)
    off["wf1"] = r;   r += H      # W_fc1.T, lane-padded to G             (H, G)
    off["bf1"] = r;   r += 8      # b_fc1, lane-padded (row 0)            (1, G)
    off["wf2"] = r;   r += H      # W_fc2.T, lane-padded to G             (H, G)
    off["bf2"] = r;   r += 8      # b_fc2, lane-padded (row 0)            (1, G)
    off["rows"] = r
    return off


def pack_params(params, dtype=jnp.float32):
    """Pack all weights/biases into one (rows, 4H) buffer (single DMA).
    Pre-fuses E1b = emb @ W_ih1.T + (b_ih1+b_hh1).  Zero padding of the fc
    sections (lanes >= O / rows >= H) is what makes the wrapper's
    out_pad[:, :O] slice correct -- jnp.pad guarantees it.
    Pass dtype=jnp.bfloat16 on v5e to halve the exposed prologue DMA."""
    emb = params["emb"]
    V, H = emb.shape
    G = 4 * H
    hi = jax.lax.Precision.HIGHEST

    b1 = (params["b_ih1"] + params["b_hh1"]).reshape(1, G)
    e1b = jnp.dot(emb, params["w_ih1"].T, precision=hi) + b1            # (V, G)
    whh1 = params["w_hh1"].T                                            # (H, G)
    whh2 = params["w_hh2"].T                                            # (H, G)
    wih2 = params["w_ih2"].T                                            # (H, G)
    b2 = (params["b_ih2"] + params["b_hh2"]).reshape(1, G)
    wf1 = params["wf1"].T                                               # (H, H)
    bf1 = params["bf1"].reshape(1, -1)
    wf2 = params["wf2"].T                                               # (H, O)
    bf2 = params["bf2"].reshape(1, -1)

    def lanes(a):              # zero-pad last dim to G
        return jnp.pad(a, ((0, 0), (0, G - a.shape[1])))

    def rows(a, n):            # zero-pad first dim to n
        return jnp.pad(a, ((0, n - a.shape[0]), (0, 0)))

    packed = jnp.concatenate([
        e1b,
        whh1,
        whh2,
        wih2,
        rows(b2, 8),
        lanes(wf1),
        rows(lanes(bf1), 8),
        lanes(wf2),
        rows(lanes(bf2), 8),
    ], axis=0).astype(dtype)
    assert packed.shape == (_offsets(V, H)["rows"], G)
    return packed


# ------------------------------- Pallas kernel ----------------------------- #
def _solver_kernel(idx_ref, pack_ref, out_ref, *, H, V, T, Bp, off):
    G = 4 * H
    TB = T * Bp

    # -- embedding + layer-1 input projection (+ b1) for ALL timesteps at once.
    #    ids arrive as a (T*Bp, 1) column -> one-hot built directly in 2D.
    idx = idx_ref[...]                                               # (TB, 1) i32
    iota = jax.lax.broadcasted_iota(jnp.int32, (TB, V), 1)
    onehot = (idx == iota).astype(jnp.float32)                       # (TB, V)
    e1b = pack_ref[off["e1"]:off["e1"] + V, :].astype(jnp.float32)   # (V, G)
    x_gates = jnp.dot(onehot, e1b, preferred_element_type=jnp.float32)  # (TB, G)

    whh1 = pack_ref[off["whh1"]:off["whh1"] + H, :].astype(jnp.float32)  # (H, G)
    whh2 = pack_ref[off["whh2"]:off["whh2"] + H, :].astype(jnp.float32)  # (H, G)
    wih2 = pack_ref[off["wih2"]:off["wih2"] + H, :].astype(jnp.float32)  # (H, G)
    # hoist the bias broadcast out of the unrolled recurrence
    b2 = jnp.broadcast_to(
        pack_ref[off["b2"]:off["b2"] + 1, :].astype(jnp.float32), (Bp, G))

    def gates_to_hc(gates, c):
        # full-width transcendentals: 2 EUP passes over (Bp, 4H) instead of 4
        sig = jax.nn.sigmoid(gates)
        tnh = jnp.tanh(gates)
        i = sig[:, 0 * H:1 * H]
        f = sig[:, 1 * H:2 * H]
        g = tnh[:, 2 * H:3 * H]
        o = sig[:, 3 * H:4 * H]
        c_new = f * c + i * g
        h_new = o * jnp.tanh(c_new)
        return h_new, c_new

    zeros = jnp.zeros((Bp, H), jnp.float32)

    # -- t = 0: hidden/cell states are zero -> skip the recurrent matmuls
    h1, c1 = gates_to_hc(x_gates[0:Bp, :], zeros)
    g2 = jnp.dot(h1, wih2, preferred_element_type=jnp.float32) + b2
    h2, c2 = gates_to_hc(g2, zeros)

    # -- t = 1 .. T-1: fully unrolled (T small & static).  Both recurrent
    #    matmuls sit at the top of the step (previous-step operands only,
    #    pipelined on the MXU); only h1_t @ W_ih2.T is on the mid-step chain.
    for t in range(1, T):
        rec1 = jnp.dot(h1, whh1, preferred_element_type=jnp.float32)
        rec2 = jnp.dot(h2, whh2, preferred_element_type=jnp.float32)
        g1 = x_gates[t * Bp:(t + 1) * Bp, :] + rec1
        h1, c1 = gates_to_hc(g1, c1)
        g2 = jnp.dot(h1, wih2, preferred_element_type=jnp.float32) + rec2 + b2
        h2, c2 = gates_to_hc(g2, c2)

    # -- fc_layers(lstm_out[:, -1]) -- lane-dense at width G; final dot uses
    #    K=H (hid lanes >= H are exactly 0 thanks to zero-padded wf1/bf1).
    wf1 = pack_ref[off["wf1"]:off["wf1"] + H, :].astype(jnp.float32)  # (H, G)
    bf1 = pack_ref[off["bf1"]:off["bf1"] + 1, :].astype(jnp.float32)  # (1, G)
    wf2 = pack_ref[off["wf2"]:off["wf2"] + H, :].astype(jnp.float32)  # (H, G)
    bf2 = pack_ref[off["bf2"]:off["bf2"] + 1, :].astype(jnp.float32)  # (1, G)

    hid = jnp.maximum(
        jnp.dot(h2, wf1, preferred_element_type=jnp.float32) + bf1, 0.0)
    out_ref[...] = jnp.dot(hid[:, :H], wf2,
                           preferred_element_type=jnp.float32) + bf2


# --------------------------------- wrapper --------------------------------- #
@partial(jax.jit, static_argnames=("H", "V", "O"))
def equation_solver_forward(idx, packed, *, H, V, O):
    B, T = idx.shape
    Bp = max(8, ((B + 7) // 8) * 8)          # sublane-padded batch
    G = 4 * H
    off = _offsets(V, H)
    # time-major, batch padded to 8 sublanes, flattened to a (T*Bp, 1) column
    # so the kernel builds the one-hot in 2D with no in-kernel reshape.
    idx_tm = jnp.zeros((T, Bp), jnp.int32).at[:, :B].set(idx.T.astype(jnp.int32))
    idx_col = idx_tm.reshape(T * Bp, 1)

    vmem = pl.BlockSpec(memory_space=pltpu.MemorySpace.VMEM)
    out_pad = pl.pallas_call(
        partial(_solver_kernel, H=H, V=V, T=T, Bp=Bp, off=off),
        out_shape=jax.ShapeDtypeStruct((Bp, G), jnp.float32),
        in_specs=[vmem, vmem],
        out_specs=vmem,
    )(idx_col, packed)
    return out_pad[:B, :O]


# --------------------------- reference (plain JAX) -------------------------- #
def reference_forward(idx, params):
    H = params["emb"].shape[1]
    x = params["emb"][idx]                                  # (B, T, H)
    B, T, _ = x.shape

    def run_layer(inp, w_ih, w_hh, b_ih, b_hh):
        h = jnp.zeros((B, H), jnp.float32)
        c = jnp.zeros((B, H), jnp.float32)
        outs = []
        for t in range(T):
            gates = inp[:, t, :] @ w_ih.T + b_ih + h @ w_hh.T + b_hh
            i = jax.nn.sigmoid(gates[:, 0 * H:1 * H])
            f = jax.nn.sigmoid(gates[:, 1 * H:2 * H])
            g = jnp.tanh(gates[:, 2 * H:3 * H])
            o = jax.nn.sigmoid(gates[:, 3 * H:4 * H])
            c = f * c + i * g
            h = o * jnp.tanh(c)
            outs.append(h)
        return jnp.stack(outs, axis=1)

    l1 = run_layer(x, params["w_ih1"], params["w_hh1"],
                   params["b_ih1"], params["b_hh1"])
    l2 = run_layer(l1, params["w_ih2"], params["w_hh2"],
                   params["b_ih2"], params["b_hh2"])
    last = l2[:, -1]
    hid = jax.nn.relu(last @ params["wf1"].T + params["bf1"])
    return hid @ params["wf2"].T + params["bf2"]


# ---------------------------------- params ---------------------------------- #
def init_params(key, hidden_size, output_size):
    H, O = hidden_size, output_size
    s = 1.0 / math.sqrt(H)
    ks = jax.random.split(key, 16)
    u = lambda k, shape: jax.random.uniform(k, shape, jnp.float32, -s, s)
    return {
        "emb":   jax.random.normal(ks[0], (VOCAB, H), jnp.float32),
        # LSTM layer 1 (PyTorch shapes: weight_ih (4H, H), weight_hh (4H, H))
        "w_ih1": u(ks[1], (4 * H, H)), "w_hh1": u(ks[2], (4 * H, H)),
        "b_ih1": u(ks[3], (4 * H,)),   "b_hh1": u(ks[4], (4 * H,)),
        # LSTM layer 2
        "w_ih2": u(ks[5], (4 * H, H)), "w_hh2": u(ks[6], (4 * H, H)),
        "b_ih2": u(ks[7], (4 * H,)),   "b_hh2": u(ks[8], (4 * H,)),
        # fc_layers: Linear(H, H) -> ReLU -> Linear(H, O)
        "wf1": u(ks[9], (H, H)),  "bf1": u(ks[10], (H,)),
        "wf2": u(ks[11], (O, H)), "bf2": u(ks[12], (O,)),
    }


if __name__ == "__main__":
    B, T, H, O = 2, 8, 32, 8
    key = jax.random.PRNGKey(0)
    k_idx, k_par = jax.random.split(key)

    idx = jax.random.randint(k_idx, (B, T), 0, VOCAB, dtype=jnp.int32)
    params = init_params(k_par, H, O)

    # Pack parameters once (outside the jitted forward).
    packed = jax.block_until_ready(pack_params(params))

    out = equation_solver_forward(idx, packed, H=H, V=VOCAB, O=O)
    out = jax.block_until_ready(out)

    ref = reference_forward(idx, params)
    assert out.shape == (B, O)
    assert jnp.allclose(out, ref, atol=2e-4, rtol=2e-4), (
        f"max abs err {jnp.max(jnp.abs(out - ref))}")
    print("KERNEL_OK")
</pallas_src>

<mosaic_0001>
module attributes {stable_mosaic.version = 11 : i64} {
  func.func @_solver_kernel(%arg0: memref<64x1xi32, #tpu.memory_space<vmem>>, %arg1: memref<200x128xf32, #tpu.memory_space<vmem>>, %arg2: memref<8x128xf32, #tpu.memory_space<vmem>>) attributes {dimension_semantics = [], scalar_prefetch = 0 : i64, scratch_operands = 0 : i64, tpu.core_type = #tpu.core_type<tc>} {
    %c0 = arith.constant 0 : index
    %c0_0 = arith.constant 0 : index
    %0 = vector.load %arg0[%c0, %c0_0] : memref<64x1xi32, #tpu.memory_space<vmem>>, vector<64x1xi32>
    %1 = tpu.iota {dimensions = array<i32: 1>} : vector<64x16xi32>
    %2 = vector.broadcast %0 : vector<64x1xi32> to vector<64x16xi32>
    %3 = arith.cmpi eq, %2, %1 : vector<64x16xi32>
    %4 = arith.extui %3 : vector<64x16xi1> to vector<64x16xi32>
    %5 = arith.sitofp %4 : vector<64x16xi32> to vector<64x16xf32>
    %c0_1 = arith.constant 0 : index
    %c0_2 = arith.constant 0 : index
    %6 = vector.load %arg1[%c0_1, %c0_2] : memref<200x128xf32, #tpu.memory_space<vmem>>, vector<16x128xf32>
    %cst = arith.constant dense<0.000000e+00> : vector<64x128xf32>
    %7 = tpu.matmul %5, %6, %cst {dimension_numbers = #tpu.dot_dimension_numbers<[1], [0], [0], [1], [0, 0, 1, 1], [], []>} : vector<64x16xf32>, vector<16x128xf32>, vector<64x128xf32> -> vector<64x128xf32>
    %c16 = arith.constant 16 : index
    %c0_3 = arith.constant 0 : index
    %8 = vector.load %arg1[%c16, %c0_3] : memref<200x128xf32, #tpu.memory_space<vmem>>, vector<32x128xf32>
    %c48 = arith.constant 48 : index
    %c0_4 = arith.constant 0 : index
    %9 = vector.load %arg1[%c48, %c0_4] : memref<200x128xf32, #tpu.memory_space<vmem>>, vector<32x128xf32>
    %c80 = arith.constant 80 : index
    %c0_5 = arith.constant 0 : index
    %10 = vector.load %arg1[%c80, %c0_5] : memref<200x128xf32, #tpu.memory_space<vmem>>, vector<32x128xf32>
    %c112 = arith.constant 112 : index
    %c0_6 = arith.constant 0 : index
    %11 = vector.load %arg1[%c112, %c0_6] : memref<200x128xf32, #tpu.memory_space<vmem>>, vector<1x128xf32>
    %12 = vector.shape_cast %11 : vector<1x128xf32> to vector<1x128xf32>
    %13 = vector.broadcast %12 : vector<1x128xf32> to vector<8x128xf32>
    %cst_7 = arith.constant 0.000000e+00 : f32
    %14 = vector.broadcast %cst_7 : f32 to vector<8x32xf32>
    %15 = vector.extract_strided_slice %7 {offsets = [0, 0], sizes = [8, 128], strides = [1, 1]} : vector<64x128xf32> to vector<8x128xf32>
    %16 = arith.negf %15 : vector<8x128xf32>
    %17 = math.exp %16 : vector<8x128xf32>
    %cst_8 = arith.constant 1.000000e+00 : f32
    %18 = vector.broadcast %cst_8 : f32 to vector<8x128xf32>
    %19 = arith.addf %18, %17 : vector<8x128xf32>
    %20 = arith.divf %18, %19 : vector<8x128xf32>
    %21 = math.tanh %15 : vector<8x128xf32>
    %22 = vector.extract_strided_slice %20 {offsets = [0, 0], sizes = [8, 32], strides = [1, 1]} : vector<8x128xf32> to vector<8x32xf32>
    %23 = vector.extract_strided_slice %20 {offsets = [0, 32], sizes = [8, 32], strides = [1, 1]} : vector<8x128xf32> to vector<8x32xf32>
    %24 = vector.extract_strided_slice %21 {offsets = [0, 64], sizes = [8, 32], strides = [1, 1]} : vector<8x128xf32> to vector<8x32xf32>
    %25 = vector.extract_strided_slice %20 {offsets = [0, 96], sizes = [8, 32], strides = [1, 1]} : vector<8x128xf32> to vector<8x32xf32>
    %26 = arith.mulf %23, %14 : vector<8x32xf32>
    %27 = arith.mulf %22, %24 : vector<8x32xf32>
    %28 = arith.addf %26, %27 : vector<8x32xf32>
    %29 = math.tanh %28 : vector<8x32xf32>
    %30 = arith.mulf %25, %29 : vector<8x32xf32>
    %cst_9 = arith.constant dense<0.000000e+00> : vector<8x128xf32>
    %31 = tpu.matmul %30, %10, %cst_9 {dimension_numbers = #tpu.dot_dimension_numbers<[1], [0], [0], [1], [0, 0, 1, 1], [], []>} : vector<8x32xf32>, vector<32x128xf32>, vector<8x128xf32> -> vector<8x128xf32>
    %32 = arith.addf %31, %13 : vector<8x128xf32>
    %33 = arith.negf %32 : vector<8x128xf32>
    %34 = math.exp %33 : vector<8x128xf32>
    %cst_10 = arith.constant 1.000000e+00 : f32
    %35 = vector.broadcast %cst_10 : f32 to vector<8x128xf32>
    %36 = arith.addf %35, %34 : vector<8x128xf32>
    %37 = arith.divf %35, %36 : vector<8x128xf32>
    %38 = math.tanh %32 : vector<8x128xf32>
    %39 = vector.extract_strided_slice %37 {offsets = [0, 0], sizes = [8, 32], strides = [1, 1]} : vector<8x128xf32> to vector<8x32xf32>
    %40 = vector.extract_strided_slice %37 {offsets = [0, 32], sizes = [8, 32], strides = [1, 1]} : vector<8x128xf32> to vector<8x32xf32>
    %41 = vector.extract_strided_slice %38 {offsets = [0, 64], sizes = [8, 32], strides = [1, 1]} : vector<8x128xf32> to vector<8x32xf32>
    %42 = vector.extract_strided_slice %37 {offsets = [0, 96], sizes = [8, 32], strides = [1, 1]} : vector<8x128xf32> to vector<8x32xf32>
    %43 = arith.mulf %40, %14 : vector<8x32xf32>
    %44 = arith.mulf %39, %41 : vector<8x32xf32>
    %45 = arith.addf %43, %44 : vector<8x32xf32>
    %46 = math.tanh %45 : vector<8x32xf32>
    %47 = arith.mulf %42, %46 : vector<8x32xf32>
    %cst_11 = arith.constant dense<0.000000e+00> : vector<8x128xf32>
    %48 = tpu.matmul %30, %8, %cst_11 {dimension_numbers = #tpu.dot_dimension_numbers<[1], [0], [0], [1], [0, 0, 1, 1], [], []>} : vector<8x32xf32>, vector<32x128xf32>, vector<8x128xf32> -> vector<8x128xf32>
    %cst_12 = arith.constant dense<0.000000e+00> : vector<8x128xf32>
    %49 = tpu.matmul %47, %9, %cst_12 {dimension_numbers = #tpu.dot_dimension_numbers<[1], [0], [0], [1], [0, 0, 1, 1], [], []>} : vector<8x32xf32>, vector<32x128xf32>, vector<8x128xf32> -> vector<8x128xf32>
    %50 = vector.extract_strided_slice %7 {offsets = [8, 0], sizes = [8, 128], strides = [1, 1]} : vector<64x128xf32> to vector<8x128xf32>
    %51 = arith.addf %50, %48 : vector<8x128xf32>
    %52 = arith.negf %51 : vector<8x128xf32>
    %53 = math.exp %52 : vector<8x128xf32>
    %cst_13 = arith.constant 1.000000e+00 : f32
    %54 = vector.broadcast %cst_13 : f32 to vector<8x128xf32>
    %55 = arith.addf %54, %53 : vector<8x128xf32>
    %56 = arith.divf %54, %55 : vector<8x128xf32>
    %57 = math.tanh %51 : vector<8x128xf32>
    %58 = vector.extract_strided_slice %56 {offsets = [0, 0], sizes = [8, 32], strides = [1, 1]} : vector<8x128xf32> to vector<8x32xf32>
    %59 = vector.extract_strided_slice %56 {offsets = [0, 32], sizes = [8, 32], strides = [1, 1]} : vector<8x128xf32> to vector<8x32xf32>
    %60 = vector.extract_strided_slice %57 {offsets = [0, 64], sizes = [8, 32], strides = [1, 1]} : vector<8x128xf32> to vector<8x32xf32>
    %61 = vector.extract_strided_slice %56 {offsets = [0, 96], sizes = [8, 32], strides = [1, 1]} : vector<8x128xf32> to vector<8x32xf32>
    %62 = arith.mulf %59, %28 : vector<8x32xf32>
    %63 = arith.mulf %58, %60 : vector<8x32xf32>
    %64 = arith.addf %62, %63 : vector<8x32xf32>
    %65 = math.tanh %64 : vector<8x32xf32>
    %66 = arith.mulf %61, %65 : vector<8x32xf32>
    %cst_14 = arith.constant dense<0.000000e+00> : vector<8x128xf32>
    %67 = tpu.matmul %66, %10, %cst_14 {dimension_numbers = #tpu.dot_dimension_numbers<[1], [0], [0], [1], [0, 0, 1, 1], [], []>} : vector<8x32xf32>, vector<32x128xf32>, vector<8x128xf32> -> vector<8x128xf32>
    %68 = arith.addf %67, %49 : vector<8x128xf32>
    %69 = arith.addf %68, %13 : vector<8x128xf32>
    %70 = arith.negf %69 : vector<8x128xf32>
    %71 = math.exp %70 : vector<8x128xf32>
    %cst_15 = arith.constant 1.000000e+00 : f32
    %72 = vector.broadcast %cst_15 : f32 to vector<8x128xf32>
    %73 = arith.addf %72, %71 : vector<8x128xf32>
    %74 = arith.divf %72, %73 : vector<8x128xf32>
    %75 = math.tanh %69 : vector<8x128xf32>
    %76 = vector.extract_strided_slice %74 {offsets = [0, 0], sizes = [8, 32], strides = [1, 1]} : vector<8x128xf32> to vector<8x32xf32>
    %77 = vector.extract_strided_slice %74 {offsets = [0, 32], sizes = [8, 32], strides = [1, 1]} : vector<8x128xf32> to vector<8x32xf32>
    %78 = vector.extract_strided_slice %75 {offsets = [0, 64], sizes = [8, 32], strides = [1, 1]} : vector<8x128xf32> to vector<8x32xf32>
    %79 = vector.extract_strided_slice %74 {offsets = [0, 96], sizes = [8, 32], strides = [1, 1]} : vector<8x128xf32> to vector<8x32xf32>
    %80 = arith.mulf %77, %45 : vector<8x32xf32>
    %81 = arith.mulf %76, %78 : vector<8x32xf32>
    %82 = arith.addf %80, %81 : vector<8x32xf32>
    %83 = math.tanh %82 : vector<8x32xf32>
    %84 = arith.mulf %79, %83 : vector<8x32xf32>
    %cst_16 = arith.constant dense<0.000000e+00> : vector<8x128xf32>
    %85 = tpu.matmul %66, %8, %cst_16 {dimension_numbers = #tpu.dot_dimension_numbers<[1], [0], [0], [1], [0, 0, 1, 1], [], []>} : vector<8x32xf32>, vector<32x128xf32>, vector<8x128xf32> -> vector<8x128xf32>
    %cst_17 = arith.constant dense<0.000000e+00> : vector<8x128xf32>
    %86 = tpu.matmul %84, %9, %cst_17 {dimension_numbers = #tpu.dot_dimension_numbers<[1], [0], [0], [1], [0, 0, 1, 1], [], []>} : vector<8x32xf32>, vector<32x128xf32>, vector<8x128xf32> -> vector<8x128xf32>
    %87 = vector.extract_strided_slice %7 {offsets = [16, 0], sizes = [8, 128], strides = [1, 1]} : vector<64x128xf32> to vector<8x128xf32>
    %88 = arith.addf %87, %85 : vector<8x128xf32>
    %89 = arith.negf %88 : vector<8x128xf32>
    %90 = math.exp %89 : vector<8x128xf32>
    %cst_18 = arith.constant 1.000000e+00 : f32
    %91 = vector.broadcast %cst_18 : f32 to vector<8x128xf32>
    %92 = arith.addf %91, %90 : vector<8x128xf32>
    %93 = arith.divf %91, %92 : vector<8x128xf32>
    %94 = math.tanh %88 : vector<8x128xf32>
    %95 = vector.extract_strided_slice %93 {offsets = [0, 0], sizes = [8, 32], strides = [1, 1]} : vector<8x128xf32> to vector<8x32xf32>
    %96 = vector.extract_strided_slice %93 {offsets = [0, 32], sizes = [8, 32], strides = [1, 1]} : vector<8x128xf32> to vector<8x32xf32>
    %97 = vector.extract_strided_slice %94 {offsets = [0, 64], sizes = [8, 32], strides = [1, 1]} : vector<8x128xf32> to vector<8x32xf32>
    %98 = vector.extract_strided_slice %93 {offsets = [0, 96], sizes = [8, 32], strides = [1, 1]} : vector<8x128xf32> to vector<8x32xf32>
    %99 = arith.mulf %96, %64 : vector<8x32xf32>
    %100 = arith.mulf %95, %97 : vector<8x32xf32>
    %101 = arith.addf %99, %100 : vector<8x32xf32>
    %102 = math.tanh %101 : vector<8x32xf32>
    %103 = arith.mulf %98, %102 : vector<8x32xf32>
    %cst_19 = arith.constant dense<0.000000e+00> : vector<8x128xf32>
    %104 = tpu.matmul %103, %10, %cst_19 {dimension_numbers = #tpu.dot_dimension_numbers<[1], [0], [0], [1], [0, 0, 1, 1], [], []>} : vector<8x32xf32>, vector<32x128xf32>, vector<8x128xf32> -> vector<8x128xf32>
    %105 = arith.addf %104, %86 : vector<8x128xf32>
    %106 = arith.addf %105, %13 : vector<8x128xf32>
    %107 = arith.negf %106 : vector<8x128xf32>
    %108 = math.exp %107 : vector<8x128xf32>
    %cst_20 = arith.constant 1.000000e+00 : f32
    %109 = vector.broadcast %cst_20 : f32 to vector<8x128xf32>
    %110 = arith.addf %109, %108 : vector<8x128xf32>
    %111 = arith.divf %109, %110 : vector<8x128xf32>
    %112 = math.tanh %106 : vector<8x128xf32>
    %113 = vector.extract_strided_slice %111 {offsets = [0, 0], sizes = [8, 32], strides = [1, 1]} : vector<8x128xf32> to vector<8x32xf32>
    %114 = vector.extract_strided_slice %111 {offsets = [0, 32], sizes = [8, 32], strides = [1, 1]} : vector<8x128xf32> to vector<8x32xf32>
    %115 = vector.extract_strided_slice %112 {offsets = [0, 64], sizes = [8, 32], strides = [1, 1]} : vector<8x128xf32> to vector<8x32xf32>
    %116 = vector.extract_strided_slice %111 {offsets = [0, 96], sizes = [8, 32], strides = [1, 1]} : vector<8x128xf32> to vector<8x32xf32>
    %117 = arith.mulf %114, %82 : vector<8x32xf32>
    %118 = arith.mulf %113, %115 : vector<8x32xf32>
    %119 = arith.addf %117, %118 : vector<8x32xf32>
    %120 = math.tanh %119 : vector<8x32xf32>
    %121 = arith.mulf %116, %120 : vector<8x32xf32>
    %cst_21 = arith.constant dense<0.000000e+00> : vector<8x128xf32>
    %122 = tpu.matmul %103, %8, %cst_21 {dimension_numbers = #tpu.dot_dimension_numbers<[1], [0], [0], [1], [0, 0, 1, 1], [], []>} : vector<8x32xf32>, vector<32x128xf32>, vector<8x128xf32> -> vector<8x128xf32>
    %cst_22 = arith.constant dense<0.000000e+00> : vector<8x128xf32>
    %123 = tpu.matmul %121, %9, %cst_22 {dimension_numbers = #tpu.dot_dimension_numbers<[1], [0], [0], [1], [0, 0, 1, 1], [], []>} : vector<8x32xf32>, vector<32x128xf32>, vector<8x128xf32> -> vector<8x128xf32>
    %124 = vector.extract_strided_slice %7 {offsets = [24, 0], sizes = [8, 128], strides = [1, 1]} : vector<64x128xf32> to vector<8x128xf32>
    %125 = arith.addf %124, %122 : vector<8x128xf32>
    %126 = arith.negf %125 : vector<8x128xf32>
    %127 = math.exp %126 : vector<8x128xf32>
    %cst_23 = arith.constant 1.000000e+00 : f32
    %128 = vector.broadcast %cst_23 : f32 to vector<8x128xf32>
    %129 = arith.addf %128, %127 : vector<8x128xf32>
    %130 = arith.divf %128, %129 : vector<8x128xf32>
    %131 = math.tanh %125 : vector<8x128xf32>
    %132 = vector.extract_strided_slice %130 {offsets = [0, 0], sizes = [8, 32], strides = [1, 1]} : vector<8x128xf32> to vector<8x32xf32>
    %133 = vector.extract_strided_slice %130 {offsets = [0, 32], sizes = [8, 32], strides = [1, 1]} : vector<8x128xf32> to vector<8x32xf32>
    %134 = vector.extract_strided_slice %131 {offsets = [0, 64], sizes = [8, 32], strides = [1, 1]} : vector<8x128xf32> to vector<8x32xf32>
    %135 = vector.extract_strided_slice %130 {offsets = [0, 96], sizes = [8, 32], strides = [1, 1]} : vector<8x128xf32> to vector<8x32xf32>
    %136 = arith.mulf %133, %101 : vector<8x32xf32>
    %137 = arith.mulf %132, %134 : vector<8x32xf32>
    %138 = arith.addf %136, %137 : vector<8x32xf32>
    %139 = math.tanh %138 : vector<8x32xf32>
    %140 = arith.mulf %135, %139 : vector<8x32xf32>
    %cst_24 = arith.constant dense<0.000000e+00> : vector<8x128xf32>
    %141 = tpu.matmul %140, %10, %cst_24 {dimension_numbers = #tpu.dot_dimension_numbers<[1], [0], [0], [1], [0, 0, 1, 1], [], []>} : vector<8x32xf32>, vector<32x128xf32>, vector<8x128xf32> -> vector<8x128xf32>
    %142 = arith.addf %141, %123 : vector<8x128xf32>
    %143 = arith.addf %142, %13 : vector<8x128xf32>
    %144 = arith.negf %143 : vector<8x128xf32>
    %145 = math.exp %144 : vector<8x128xf32>
    %cst_25 = arith.constant 1.000000e+00 : f32
    %146 = vector.broadcast %cst_25 : f32 to vector<8x128xf32>
    %147 = arith.addf %146, %145 : vector<8x128xf32>
    %148 = arith.divf %146, %147 : vector<8x128xf32>
    %149 = math.tanh %143 : vector<8x128xf32>
    %150 = vector.extract_strided_slice %148 {offsets = [0, 0], sizes = [8, 32], strides = [1, 1]} : vector<8x128xf32> to vector<8x32xf32>
    %151 = vector.extract_strided_slice %148 {offsets = [0, 32], sizes = [8, 32], strides = [1, 1]} : vector<8x128xf32> to vector<8x32xf32>
    %152 = vector.extract_strided_slice %149 {offsets = [0, 64], sizes = [8, 32], strides = [1, 1]} : vector<8x128xf32> to vector<8x32xf32>
    %153 = vector.extract_strided_slice %148 {offsets = [0, 96], sizes = [8, 32], strides = [1, 1]} : vector<8x128xf32> to vector<8x32xf32>
    %154 = arith.mulf %151, %119 : vector<8x32xf32>
    %155 = arith.mulf %150, %152 : vector<8x32xf32>
    %156 = arith.addf %154, %155 : vector<8x32xf32>
    %157 = math.tanh %156 : vector<8x32xf32>
    %158 = arith.mulf %153, %157 : vector<8x32xf32>
    %cst_26 = arith.constant dense<0.000000e+00> : vector<8x128xf32>
    %159 = tpu.matmul %140, %8, %cst_26 {dimension_numbers = #tpu.dot_dimension_numbers<[1], [0], [0], [1], [0, 0, 1, 1], [], []>} : vector<8x32xf32>, vector<32x128xf32>, vector<8x128xf32> -> vector<8x128xf32>
    %cst_27 = arith.constant dense<0.000000e+00> : vector<8x128xf32>
    %160 = tpu.matmul %158, %9, %cst_27 {dimension_numbers = #tpu.dot_dimension_numbers<[1], [0], [0], [1], [0, 0, 1, 1], [], []>} : vector<8x32xf32>, vector<32x128xf32>, vector<8x128xf32> -> vector<8x128xf32>
    %161 = vector.extract_strided_slice %7 {offsets = [32, 0], sizes = [8, 128], strides = [1, 1]} : vector<64x128xf32> to vector<8x128xf32>
    %162 = arith.addf %161, %159 : vector<8x128xf32>
    %163 = arith.negf %162 : vector<8x128xf32>
    %164 = math.exp %163 : vector<8x128xf32>
    %cst_28 = arith.constant 1.000000e+00 : f32
    %165 = vector.broadcast %cst_28 : f32 to vector<8x128xf32>
    %166 = arith.addf %165, %164 : vector<8x128xf32>
    %167 = arith.divf %165, %166 : vector<8x128xf32>
    %168 = math.tanh %162 : vector<8x128xf32>
    %169 = vector.extract_strided_slice %167 {offsets = [0, 0], sizes = [8, 32], strides = [1, 1]} : vector<8x128xf32> to vector<8x32xf32>
    %170 = vector.extract_strided_slice %167 {offsets = [0, 32], sizes = [8, 32], strides = [1, 1]} : vector<8x128xf32> to vector<8x32xf32>
    %171 = vector.extract_strided_slice %168 {offsets = [0, 64], sizes = [8, 32], strides = [1, 1]} : vector<8x128xf32> to vector<8x32xf32>
    %172 = vector.extract_strided_slice %167 {offsets = [0, 96], sizes = [8, 32], strides = [1, 1]} : vector<8x128xf32> to vector<8x32xf32>
    %173 = arith.mulf %170, %138 : vector<8x32xf32>
    %174 = arith.mulf %169, %171 : vector<8x32xf32>
    %175 = arith.addf %173, %174 : vector<8x32xf32>
    %176 = math.tanh %175 : vector<8x32xf32>
    %177 = arith.mulf %172, %176 : vector<8x32xf32>
    %cst_29 = arith.constant dense<0.000000e+00> : vector<8x128xf32>
    %178 = tpu.matmul %177, %10, %cst_29 {dimension_numbers = #tpu.dot_dimension_numbers<[1], [0], [0], [1], [0, 0, 1, 1], [], []>} : vector<8x32xf32>, vector<32x128xf32>, vector<8x128xf32> -> vector<8x128xf32>
    %179 = arith.addf %178, %160 : vector<8x128xf32>
    %180 = arith.addf %179, %13 : vector<8x128xf32>
    %181 = arith.negf %180 : vector<8x128xf32>
    %182 = math.exp %181 : vector<8x128xf32>
    %cst_30 = arith.constant 1.000000e+00 : f32
    %183 = vector.broadcast %cst_30 : f32 to vector<8x128xf32>
    %184 = arith.addf %183, %182 : vector<8x128xf32>
    %185 = arith.divf %183, %184 : vector<8x128xf32>
    %186 = math.tanh %180 : vector<8x128xf32>
    %187 = vector.extract_strided_slice %185 {offsets = [0, 0], sizes = [8, 32], strides = [1, 1]} : vector<8x128xf32> to vector<8x32xf32>
    %188 = vector.extract_strided_slice %185 {offsets = [0, 32], sizes = [8, 32], strides = [1, 1]} : vector<8x128xf32> to vector<8x32xf32>
    %189 = vector.extract_strided_slice %186 {offsets = [0, 64], sizes = [8, 32], strides = [1, 1]} : vector<8x128xf32> to vector<8x32xf32>
    %190 = vector.extract_strided_slice %185 {offsets = [0, 96], sizes = [8, 32], strides = [1, 1]} : vector<8x128xf32> to vector<8x32xf32>
    %191 = arith.mulf %188, %156 : vector<8x32xf32>
    %192 = arith.mulf %187, %189 : vector<8x32xf32>
    %193 = arith.addf %191, %192 : vector<8x32xf32>
    %194 = math.tanh %193 : vector<8x32xf32>
    %195 = arith.mulf %190, %194 : vector<8x32xf32>
    %cst_31 = arith.constant dense<0.000000e+00> : vector<8x128xf32>
    %196 = tpu.matmul %177, %8, %cst_31 {dimension_numbers = #tpu.dot_dimension_numbers<[1], [0], [0], [1], [0, 0, 1, 1], [], []>} : vector<8x32xf32>, vector<32x128xf32>, vector<8x128xf32> -> vector<8x128xf32>
    %cst_32 = arith.constant dense<0.000000e+00> : vector<8x128xf32>
    %197 = tpu.matmul %195, %9, %cst_32 {dimension_numbers = #tpu.dot_dimension_numbers<[1], [0], [0], [1], [0, 0, 1, 1], [], []>} : vector<8x32xf32>, vector<32x128xf32>, vector<8x128xf32> -> vector<8x128xf32>
    %198 = vector.extract_strided_slice %7 {offsets = [40, 0], sizes = [8, 128], strides = [1, 1]} : vector<64x128xf32> to vector<8x128xf32>
    %199 = arith.addf %198, %196 : vector<8x128xf32>
    %200 = arith.negf %199 : vector<8x128xf32>
    %201 = math.exp %200 : vector<8x128xf32>
    %cst_33 = arith.constant 1.000000e+00 : f32
    %202 = vector.broadcast %cst_33 : f32 to vector<8x128xf32>
    %203 = arith.addf %202, %201 : vector<8x128xf32>
    %204 = arith.divf %202, %203 : vector<8x128xf32>
    %205 = math.tanh %199 : vector<8x128xf32>
    %206 = vector.extract_strided_slice %204 {offsets = [0, 0], sizes = [8, 32], strides = [1, 1]} : vector<8x128xf32> to vector<8x32xf32>
    %207 = vector.extract_strided_slice %204 {offsets = [0, 32], sizes = [8, 32], strides = [1, 1]} : vector<8x128xf32> to vector<8x32xf32>
    %208 = vector.extract_strided_slice %205 {offsets = [0, 64], sizes = [8, 32], strides = [1, 1]} : vector<8x128xf32> to vector<8x32xf32>
    %209 = vector.extract_strided_slice %204 {offsets = [0, 96], sizes = [8, 32], strides = [1, 1]} : vector<8x128xf32> to vector<8x32xf32>
    %210 = arith.mulf %207, %175 : vector<8x32xf32>
    %211 = arith.mulf %206, %208 : vector<8x32xf32>
    %212 = arith.addf %210, %211 : vector<8x32xf32>
    %213 = math.tanh %212 : vector<8x32xf32>
    %214 = arith.mulf %209, %213 : vector<8x32xf32>
    %cst_34 = arith.constant dense<0.000000e+00> : vector<8x128xf32>
    %215 = tpu.matmul %214, %10, %cst_34 {dimension_numbers = #tpu.dot_dimension_numbers<[1], [0], [0], [1], [0, 0, 1, 1], [], []>} : vector<8x32xf32>, vector<32x128xf32>, vector<8x128xf32> -> vector<8x128xf32>
    %216 = arith.addf %215, %197 : vector<8x128xf32>
    %217 = arith.addf %216, %13 : vector<8x128xf32>
    %218 = arith.negf %217 : vector<8x128xf32>
    %219 = math.exp %218 : vector<8x128xf32>
    %cst_35 = arith.constant 1.000000e+00 : f32
    %220 = vector.broadcast %cst_35 : f32 to vector<8x128xf32>
    %221 = arith.addf %220, %219 : vector<8x128xf32>
    %222 = arith.divf %220, %221 : vector<8x128xf32>
    %223 = math.tanh %217 : vector<8x128xf32>
    %224 = vector.extract_strided_slice %222 {offsets = [0, 0], sizes = [8, 32], strides = [1, 1]} : vector<8x128xf32> to vector<8x32xf32>
    %225 = vector.extract_strided_slice %222 {offsets = [0, 32], sizes = [8, 32], strides = [1, 1]} : vector<8x128xf32> to vector<8x32xf32>
    %226 = vector.extract_strided_slice %223 {offsets = [0, 64], sizes = [8, 32], strides = [1, 1]} : vector<8x128xf32> to vector<8x32xf32>
    %227 = vector.extract_strided_slice %222 {offsets = [0, 96], sizes = [8, 32], strides = [1, 1]} : vector<8x128xf32> to vector<8x32xf32>
    %228 = arith.mulf %225, %193 : vector<8x32xf32>
    %229 = arith.mulf %224, %226 : vector<8x32xf32>
    %230 = arith.addf %228, %229 : vector<8x32xf32>
    %231 = math.tanh %230 : vector<8x32xf32>
    %232 = arith.mulf %227, %231 : vector<8x32xf32>
    %cst_36 = arith.constant dense<0.000000e+00> : vector<8x128xf32>
    %233 = tpu.matmul %214, %8, %cst_36 {dimension_numbers = #tpu.dot_dimension_numbers<[1], [0], [0], [1], [0, 0, 1, 1], [], []>} : vector<8x32xf32>, vector<32x128xf32>, vector<8x128xf32> -> vector<8x128xf32>
    %cst_37 = arith.constant dense<0.000000e+00> : vector<8x128xf32>
    %234 = tpu.matmul %232, %9, %cst_37 {dimension_numbers = #tpu.dot_dimension_numbers<[1], [0], [0], [1], [0, 0, 1, 1], [], []>} : vector<8x32xf32>, vector<32x128xf32>, vector<8x128xf32> -> vector<8x128xf32>
    %235 = vector.extract_strided_slice %7 {offsets = [48, 0], sizes = [8, 128], strides = [1, 1]} : vector<64x128xf32> to vector<8x128xf32>
    %236 = arith.addf %235, %233 : vector<8x128xf32>
    %237 = arith.negf %236 : vector<8x128xf32>
    %238 = math.exp %237 : vector<8x128xf32>
    %cst_38 = arith.constant 1.000000e+00 : f32
    %239 = vector.broadcast %cst_38 : f32 to vector<8x128xf32>
    %240 = arith.addf %239, %238 : vector<8x128xf32>
    %241 = arith.divf %239, %240 : vector<8x128xf32>
    %242 = math.tanh %236 : vector<8x128xf32>
    %243 = vector.extract_strided_slice %241 {offsets = [0, 0], sizes = [8, 32], strides = [1, 1]} : vector<8x128xf32> to vector<8x32xf32>
    %244 = vector.extract_strided_slice %241 {offsets = [0, 32], sizes = [8, 32], strides = [1, 1]} : vector<8x128xf32> to vector<8x32xf32>
    %245 = vector.extract_strided_slice %242 {offsets = [0, 64], sizes = [8, 32], strides = [1, 1]} : vector<8x128xf32> to vector<8x32xf32>
    %246 = vector.extract_strided_slice %241 {offsets = [0, 96], sizes = [8, 32], strides = [1, 1]} : vector<8x128xf32> to vector<8x32xf32>
    %247 = arith.mulf %244, %212 : vector<8x32xf32>
    %248 = arith.mulf %243, %245 : vector<8x32xf32>
    %249 = arith.addf %247, %248 : vector<8x32xf32>
    %250 = math.tanh %249 : vector<8x32xf32>
    %251 = arith.mulf %246, %250 : vector<8x32xf32>
    %cst_39 = arith.constant dense<0.000000e+00> : vector<8x128xf32>
    %252 = tpu.matmul %251, %10, %cst_39 {dimension_numbers = #tpu.dot_dimension_numbers<[1], [0], [0], [1], [0, 0, 1, 1], [], []>} : vector<8x32xf32>, vector<32x128xf32>, vector<8x128xf32> -> vector<8x128xf32>
    %253 = arith.addf %252, %234 : vector<8x128xf32>
    %254 = arith.addf %253, %13 : vector<8x128xf32>
    %255 = arith.negf %254 : vector<8x128xf32>
    %256 = math.exp %255 : vector<8x128xf32>
    %cst_40 = arith.constant 1.000000e+00 : f32
    %257 = vector.broadcast %cst_40 : f32 to vector<8x128xf32>
    %258 = arith.addf %257, %256 : vector<8x128xf32>
    %259 = arith.divf %257, %258 : vector<8x128xf32>
    %260 = math.tanh %254 : vector<8x128xf32>
    %261 = vector.extract_strided_slice %259 {offsets = [0, 0], sizes = [8, 32], strides = [1, 1]} : vector<8x128xf32> to vector<8x32xf32>
    %262 = vector.extract_strided_slice %259 {offsets = [0, 32], sizes = [8, 32], strides = [1, 1]} : vector<8x128xf32> to vector<8x32xf32>
    %263 = vector.extract_strided_slice %260 {offsets = [0, 64], sizes = [8, 32], strides = [1, 1]} : vector<8x128xf32> to vector<8x32xf32>
    %264 = vector.extract_strided_slice %259 {offsets = [0, 96], sizes = [8, 32], strides = [1, 1]} : vector<8x128xf32> to vector<8x32xf32>
    %265 = arith.mulf %262, %230 : vector<8x32xf32>
    %266 = arith.mulf %261, %263 : vector<8x32xf32>
    %267 = arith.addf %265, %266 : vector<8x32xf32>
    %268 = math.tanh %267 : vector<8x32xf32>
    %269 = arith.mulf %264, %268 : vector<8x32xf32>
    %cst_41 = arith.constant dense<0.000000e+00> : vector<8x128xf32>
    %270 = tpu.matmul %251, %8, %cst_41 {dimension_numbers = #tpu.dot_dimension_numbers<[1], [0], [0], [1], [0, 0, 1, 1], [], []>} : vector<8x32xf32>, vector<32x128xf32>, vector<8x128xf32> -> vector<8x128xf32>
    %cst_42 = arith.constant dense<0.000000e+00> : vector<8x128xf32>
    %271 = tpu.matmul %269, %9, %cst_42 {dimension_numbers = #tpu.dot_dimension_numbers<[1], [0], [0], [1], [0, 0, 1, 1], [], []>} : vector<8x32xf32>, vector<32x128xf32>, vector<8x128xf32> -> vector<8x128xf32>
    %272 = vector.extract_strided_slice %7 {offsets = [56, 0], sizes = [8, 128], strides = [1, 1]} : vector<64x128xf32> to vector<8x128xf32>
    %273 = arith.addf %272, %270 : vector<8x128xf32>
    %274 = arith.negf %273 : vector<8x128xf32>
    %275 = math.exp %274 : vector<8x128xf32>
    %cst_43 = arith.constant 1.000000e+00 : f32
    %276 = vector.broadcast %cst_43 : f32 to vector<8x128xf32>
    %277 = arith.addf %276, %275 : vector<8x128xf32>
    %278 = arith.divf %276, %277 : vector<8x128xf32>
    %279 = math.tanh %273 : vector<8x128xf32>
    %280 = vector.extract_strided_slice %278 {offsets = [0, 0], sizes = [8, 32], strides = [1, 1]} : vector<8x128xf32> to vector<8x32xf32>
    %281 = vector.extract_strided_slice %278 {offsets = [0, 32], sizes = [8, 32], strides = [1, 1]} : vector<8x128xf32> to vector<8x32xf32>
    %282 = vector.extract_strided_slice %279 {offsets = [0, 64], sizes = [8, 32], strides = [1, 1]} : vector<8x128xf32> to vector<8x32xf32>
    %283 = vector.extract_strided_slice %278 {offsets = [0, 96], sizes = [8, 32], strides = [1, 1]} : vector<8x128xf32> to vector<8x32xf32>
    %284 = arith.mulf %281, %249 : vector<8x32xf32>
    %285 = arith.mulf %280, %282 : vector<8x32xf32>
    %286 = arith.addf %284, %285 : vector<8x32xf32>
    %287 = math.tanh %286 : vector<8x32xf32>
    %288 = arith.mulf %283, %287 : vector<8x32xf32>
    %cst_44 = arith.constant dense<0.000000e+00> : vector<8x128xf32>
    %289 = tpu.matmul %288, %10, %cst_44 {dimension_numbers = #tpu.dot_dimension_numbers<[1], [0], [0], [1], [0, 0, 1, 1], [], []>} : vector<8x32xf32>, vector<32x128xf32>, vector<8x128xf32> -> vector<8x128xf32>
    %290 = arith.addf %289, %271 : vector<8x128xf32>
    %291 = arith.addf %290, %13 : vector<8x128xf32>
    %292 = arith.negf %291 : vector<8x128xf32>
    %293 = math.exp %292 : vector<8x128xf32>
    %cst_45 = arith.constant 1.000000e+00 : f32
    %294 = vector.broadcast %cst_45 : f32 to vector<8x128xf32>
    %295 = arith.addf %294, %293 : vector<8x128xf32>
    %296 = arith.divf %294, %295 : vector<8x128xf32>
    %297 = math.tanh %291 : vector<8x128xf32>
    %298 = vector.extract_strided_slice %296 {offsets = [0, 0], sizes = [8, 32], strides = [1, 1]} : vector<8x128xf32> to vector<8x32xf32>
    %299 = vector.extract_strided_slice %296 {offsets = [0, 32], sizes = [8, 32], strides = [1, 1]} : vector<8x128xf32> to vector<8x32xf32>
    %300 = vector.extract_strided_slice %297 {offsets = [0, 64], sizes = [8, 32], strides = [1, 1]} : vector<8x128xf32> to vector<8x32xf32>
    %301 = vector.extract_strided_slice %296 {offsets = [0, 96], sizes = [8, 32], strides = [1, 1]} : vector<8x128xf32> to vector<8x32xf32>
    %302 = arith.mulf %299, %267 : vector<8x32xf32>
    %303 = arith.mulf %298, %300 : vector<8x32xf32>
    %304 = arith.addf %302, %303 : vector<8x32xf32>
    %305 = math.tanh %304 : vector<8x32xf32>
    %306 = arith.mulf %301, %305 : vector<8x32xf32>
    %c120 = arith.constant 120 : index
    %c0_46 = arith.constant 0 : index
    %307 = vector.load %arg1[%c120, %c0_46] : memref<200x128xf32, #tpu.memory_space<vmem>>, vector<32x128xf32>
    %c152 = arith.constant 152 : index
    %c0_47 = arith.constant 0 : index
    %308 = vector.load %arg1[%c152, %c0_47] : memref<200x128xf32, #tpu.memory_space<vmem>>, vector<1x128xf32>
    %c160 = arith.constant 160 : index
    %c0_48 = arith.constant 0 : index
    %309 = vector.load %arg1[%c160, %c0_48] : memref<200x128xf32, #tpu.memory_space<vmem>>, vector<32x128xf32>
    %c192 = arith.constant 192 : index
    %c0_49 = arith.constant 0 : index
    %310 = vector.load %arg1[%c192, %c0_49] : memref<200x128xf32, #tpu.memory_space<vmem>>, vector<1x128xf32>
    %cst_50 = arith.constant dense<0.000000e+00> : vector<8x128xf32>
    %311 = tpu.matmul %306, %307, %cst_50 {dimension_numbers = #tpu.dot_dimension_numbers<[1], [0], [0], [1], [0, 0, 1, 1], [], []>} : vector<8x32xf32>, vector<32x128xf32>, vector<8x128xf32> -> vector<8x128xf32>
    %312 = vector.broadcast %308 : vector<1x128xf32> to vector<8x128xf32>
    %313 = arith.addf %311, %312 : vector<8x128xf32>
    %cst_51 = arith.constant 0.000000e+00 : f32
    %314 = vector.broadcast %cst_51 : f32 to vector<8x128xf32>
    %315 = arith.maximumf %313, %314 : vector<8x128xf32>
    %316 = vector.extract_strided_slice %315 {offsets = [0, 0], sizes = [8, 32], strides = [1, 1]} : vector<8x128xf32> to vector<8x32xf32>
    %cst_52 = arith.constant dense<0.000000e+00> : vector<8x128xf32>
    %317 = tpu.matmul %316, %309, %cst_52 {dimension_numbers = #tpu.dot_dimension_numbers<[1], [0], [0], [1], [0, 0, 1, 1], [], []>} : vector<8x32xf32>, vector<32x128xf32>, vector<8x128xf32> -> vector<8x128xf32>
    %318 = vector.broadcast %310 : vector<1x128xf32> to vector<8x128xf32>
    %319 = arith.addf %317, %318 : vector<8x128xf32>
    %c0_53 = arith.constant 0 : index
    %c0_54 = arith.constant 0 : index
    %320 = vector.load %arg2[%c0_53, %c0_54] : memref<8x128xf32, #tpu.memory_space<vmem>>, vector<8x128xf32>
    tpu.vector_store %arg2[%c0_53, %c0_54], %319 {strides = array<i32>} : memref<8x128xf32, #tpu.memory_space<vmem>>, vector<8x128xf32>,
    return
  }
}

</mosaic_0001>

<bundles_post_ra>
// kernel: equation_solver_forward.1
= control target key start
LH: loop header
LB: loop body
LE: loop exit
PB: predicated region body
PF: predicated region fallthrough
CT: control target
= control target key end

     0   :  { %7 = vsyncpa [#allocation3], 0  ;;  %s1583_s12 = smov [#allocation2]   ;;  %s1584_s14 = smov 128   ;;  %s1921_s0 = inlined_call_operand.vmem [shape: s32[64,1], index: 0, kind: input, shape index: {}]   ;;  %s1922_s1 = inlined_call_operand.hbm [shape: f32[200,128], index: 1, kind: input, shape index: {}]   ;;  %s1923_s2 = inlined_call_operand.vmem [shape: f32[8,128], index: 2, kind: output, shape index: {}]  }
   0x1   :  { %s14_s11 = sshll.u32 %s1922_s1, 4  ;;  %s16_s13 = sshll.u32 %s1583_s12, 4  ;;  %s15_s11 = int_to_ptr.hbm [resolvable:$true] %s14_s11  ;;  %s17_s13 = int_to_ptr.vmem [resolvable:$true] %s16_s13 }
   0x2   :  { %s1585_s15 = smov 8  }
   0x3   :  { %22 = dma.hbm_to_vmem [thread:$0]  %s15_s11, 3200, %s17_s13, [#allocation3], %s1584_s14, %s1584_s14, %s1585_s15  }
   0x4   :  { %1581 = dma.done.wait [#allocation3], 3200  }
   0x5   :  { %1582 = vsyncadd [#allocation3], 4294964096  ;;  %v1586_v0 = vmov 0   ;;  %v27_v1 = vld [vmem:[%s1921_s0] sm:$0xff]  ;;  %v86_v2 = vld [vmem:[#allocation2 + $0x8] sm:$0xff]  ;;  %v35_v4 = vlaneseq  ;;  %vm87_vm0 = vcmask 130048  }
   0x6   :  { %1419 = vset.pattern.permute.xlu0 %v1586_v0  ;;  %1420 = vset.pattern.permute.xlu2 %v1586_v0  ;;  %v85_v3 = vld [vmem:[#allocation2] sm:$0xff]  ;;  %v1587_v7 = vmov 0.0   ;;  %s1588_s1 = smov 64   ;;  %s1589_s18 = smov 32   ;;  %v1622_v30 = vld [vmem:[#allocation2 + $0x68] sm:$0xff]  ;;  %v1632_v34 = vld [vmem:[#allocation2 + $0x58] sm:$0xff] }
   0x7   :  { %38 = vperm.xlu0 %1419, %v27_v1   ;;  %126 = vmatpush.msra.mxu0 %v86_v2  ;;  %v1611_v5 = vand.u32 127, %v35_v4  ;;  %v1624_v31 = vld [vmem:[#allocation2 + $0x28] sm:$0xff]  ;;  %v1626_v32 = vld [vmem:[#allocation2 + $0x60] sm:$0xff]  ;;  %v1634_v35 = vld [vmem:[#allocation2 + $0x18] sm:$0xff]  ;;  %vm207_vm6 = vcmask 261120  }
   0x8   :  { %222 = vmatpush.msra.mxu1 %v1622_v30  ;;  %279 = vmatpush.msra.mxu2 %v1624_v31  ;;  %v1630_v33 = vld [vmem:[#allocation2 + $0x20] sm:$0xff]  ;;  %v1638_v36 = vld [vmem:[#allocation2 + $0x50] sm:$0xff]  ;;  %v28_v40 = vld [vmem:[%s1921_s0 + $0x8] sm:$0xff] }
   0x9   :  { %127 = vmatpush.msra.mxu0 %v85_v3  ;;  %v1640_v37 = vld [vmem:[#allocation2 + $0x10] sm:$0xff] }
   0xa   :  { %223 = vmatpush.msra.mxu1 %v1626_v32  ;;  %280 = vmatpush.msra.mxu2 %v1630_v33  ;;  %v1671_v44 = vld [vmem:[#allocation2 + $0x70] ss:$0 sm:$0xff] }
   0xc   :  { %224 = vmatpush.msra.mxu1 %v1632_v34  ;;  %281 = vmatpush.msra.mxu2 %v1634_v35 }
   0xe   :  { %225 = vmatpush.msra.mxu1 %v1638_v36  ;;  %282 = vmatpush.msra.mxu2 %v1640_v37 }
  0x10   :  { %367 = vmatpush.msrb.mxu1 %v1622_v30  ;;  %425 = vmatpush.msrb.mxu2 %v1624_v31 }
  0x12   :  { %368 = vmatpush.msrb.mxu1 %v1626_v32  ;;  %426 = vmatpush.msrb.mxu2 %v1630_v33 }
  0x14   :  { %369 = vmatpush.msrb.mxu1 %v1632_v34  ;;  %427 = vmatpush.msrb.mxu2 %v1634_v35 }
  0x16   :  { %370 = vmatpush.msrb.mxu1 %v1638_v36  ;;  %428 = vmatpush.msrb.mxu2 %v1640_v37 }
  0x79   :  { %v39_v6 = vpop.permute.xlu0 %38 }
  0x7a   :  { %vm61_vm1 = vcmp.eq.s32.totalorder %v39_v6, %v1611_v5 }
  0x7b   :  { %v1356_v8 = vsel %vm61_vm1, 1.0, %v1587_v7 }
  0x7c   :  { %1364 = vmatmul.msk.f32.vlgmr.msra.gmra.mxu0 %vm87_vm0, %v1356_v8 }
  0xf9   :  { %v129_v9 = vpop.f32.mrf.mxu0 }
  0xfa   :  { %1424 = vtanh.f32 %v129_v9  ;;  %v1372_v11 = vmul.f32 -1.442695, %v129_v9 }
  0xfc   :  { %1426 = vpow2.f32 %v1372_v11 }
 0x100   :  { %v1425_v10 = vpop.eup %1424 }
 0x101   :  { %189 = vrot.lane.b32.xlu0 %v1425_v10, %s1588_s1 }
 0x102   :  { %v1427_v12 = vpop.eup %1426 }
 0x103   :  { %v170_v13 = vadd.f32 1.0, %v1427_v12 }
 0x105   :  { %1428 = vrcp.f32 %v170_v13  ;;  %v182_v19 = vand.u32 2147483648, %v170_v13  ;;  %vm176_vm3 = vweird.f32 %v170_v13  ;;  %v180_v20 = vand.u32 2147483647, %v170_v13 }
 0x107   :  { %v183_v22 = vor.u32 1.1754944e-38, %v182_v19  ;;  %vm181_vm5 = vcmp.eq.f32.partialorder %v180_v20, 8.507059e+37 }
 0x10b   :  { %v1429_v14 = vpop.eup %1428 }
 0x10c   :  { %v172_v15 = vmul.f32 %v1429_v14, %v170_v13  ;;  %vm177_vm2 = vweird.f32 %v1429_v14 }
 0x10d   :  { %vm178_vm4 = vmor %vm176_vm3, %vm177_vm2 }
 0x10e   :  { %v173_v16 = vsub.f32 1.0, %v172_v15 }
 0x110   :  { %v174_v17 = vmul.f32 %v1429_v14, %v173_v16 }
 0x112   :  { %v175_v18 = vadd.f32 %v1429_v14, %v174_v17 }
 0x114   :  { %v179_v21 = vsel %vm178_vm4, %v1429_v14, %v175_v18 }
 0x115   :  { %v184_v24 = vsel %vm181_vm5, %v183_v22, %v179_v21 }
 0x116   :  { %v187_v26 = vmul.f32 0.0, %v184_v24 }
 0x173   :  { %v190_v23 = vpop.permute.xlu0 %189 }
 0x174   :  { %v192_v25 = vmul.f32 %v190_v23, %v184_v24 }
 0x176   :  { %194 = vrot.lane.b32.xlu1 %v192_v25, %s1589_s18 }
 0x1e8   :  { %v195_v27 = vpop.permute.xlu1 %194 }
 0x1e9   :  { %v1618_v28 = vadd.f32 %v195_v27, %v187_v26 }
 0x1eb   :  { %1430 = vtanh.f32 %v1618_v28 }
 0x1f1   :  { %v1431_v29 = vpop.eup %1430 }
 0x1f2   :  { %200 = vrot.lane.b32.xlu1 %v1431_v29, %s1588_s1  ;;  %v29_v29 = vld [vmem:[%s1921_s0 + $0x10] sm:$0xff] }
 0x264   :  { %v201_v38 = vpop.permute.xlu1 %200 }
 0x265   :  { %v203_v39 = vmul.f32 %v201_v38, %v184_v24  ;;  %v1690_v38 = vld [vmem:[#allocation2 + $0x48] sm:$0xff] }
 0x266   :  { %304 = vmatpush.msra.mxu3 %v1690_v38 }
 0x267   :  { %205 = vrot.lane.b32.xlu2 %v203_v39, %s1589_s18  ;;  %v1692_v39 = vld [vmem:[#allocation2 + $0x40] sm:$0xff] }
 0x268   :  { %305 = vmatpush.msra.mxu3 %v1692_v39 }
 0x26f   :  { %41 = vperm.xlu2 %1420, %v28_v40   ;;  %v1698_v40 = vld [vmem:[#allocation2 + $0x30] sm:$0xff] }
 0x2c1   :  { %v206_v41 = vpop.permute.xlu2 %205 }
 0x2c2   :  { %1373 = vmatmul.msk.f32.vlgmr.msra.gmra.mxu1 %vm207_vm6, %v206_v41  ;;  %1375 = vmatmul.msk.f32.vlgmr.msra.gmra.mxu2 %vm207_vm6, %v206_v41 }
 0x2c3   :  { %513 = vmatpush.msra.mxu1 %v1622_v30  ;;  %571 = vmatpush.msra.mxu2 %v1624_v31 }
 0x2c5   :  { %514 = vmatpush.msra.mxu1 %v1626_v32  ;;  %572 = vmatpush.msra.mxu2 %v1630_v33 }
 0x2c7   :  { %515 = vmatpush.msra.mxu1 %v1632_v34  ;;  %573 = vmatpush.msra.mxu2 %v1634_v35 }
 0x2c9   :  { %v42_v42 = vpop.permute.xlu2 %41  ;;  %516 = vmatpush.msra.mxu1 %v1638_v36  ;;  %574 = vmatpush.msra.mxu2 %v1640_v37 }
 0x2ca   :  { %vm62_vm7 = vcmp.eq.s32.totalorder %v42_v42, %v1611_v5 }
 0x2cb   :  { %v1357_v43 = vsel %vm62_vm7, 1.0, %v1587_v7 }
 0x2cc   :  { %1365 = vmatmul.msk.f32.gmra.mxu0 %vm87_vm0, %v1357_v43 }
 0x33f   :  { %v227_v45 = vpop.f32.mrf.mxu1 }
 0x340   :  { %v228_v46 = vadd.f32 %v1671_v44, %v227_v45 }
 0x342   :  { %1432 = vtanh.f32 %v228_v46  ;;  %v1374_v52 = vmul.f32 -1.442695, %v228_v46 }
 0x345   :  { %v284_v48 = vpop.f32.mrf.mxu2 }
 0x348   :  { %v1433_v47 = vpop.eup %1432 }
 0x349   :  { %252 = vrot.lane.b32.xlu0 %v1433_v47, %s1588_s1  ;;  %v132_v49 = vpop.f32.mrf.mxu0 }
 0x34a   :  { %v312_v50 = vadd.f32 %v284_v48, %v132_v49 }
 0x34c   :  { %1434 = vtanh.f32 %v312_v50  ;;  %v1377_v54 = vmul.f32 -1.442695, %v312_v50 }
 0x34d   :  { %1436 = vpow2.f32 %v1374_v52 }
 0x34e   :  { %1438 = vpow2.f32 %v1377_v54 }
 0x352   :  { %v1435_v51 = vpop.eup %1434 }
 0x353   :  { %335 = vrot.lane.b32.xlu1 %v1435_v51, %s1588_s1  ;;  %v1437_v53 = vpop.eup %1436 }
 0x354   :  { %v233_v55 = vadd.f32 1.0, %v1437_v53  ;;  %v1439_v56 = vpop.eup %1438 }
 0x355   :  { %v316_v58 = vadd.f32 1.0, %v1439_v56 }
 0x356   :  { %1440 = vrcp.f32 %v233_v55  ;;  %v245_v1 = vand.u32 2147483648, %v233_v55  ;;  %vm239_vm9 = vweird.f32 %v233_v55  ;;  %v243_v2 = vand.u32 2147483647, %v233_v55 }
 0x357   :  { %1442 = vrcp.f32 %v316_v58  ;;  %v328_v13 = vand.u32 2147483648, %v316_v58  ;;  %vm322_vm13 = vweird.f32 %v316_v58  ;;  %v326_v14 = vand.u32 2147483647, %v316_v58 }
 0x358   :  { %v246_v6 = vor.u32 1.1754944e-38, %v245_v1  ;;  %vm244_vm11 = vcmp.eq.f32.partialorder %v243_v2, 8.507059e+37 }
 0x359   :  { %v329_v16 = vor.u32 1.1754944e-38, %v328_v13  ;;  %vm327_vm15 = vcmp.eq.f32.partialorder %v326_v14, 8.507059e+37 }
 0x35c   :  { %v1441_v57 = vpop.eup %1440 }
 0x35d   :  { %v235_v59 = vmul.f32 %v1441_v57, %v233_v55  ;;  %v1443_v61 = vpop.eup %1442  ;;  %vm240_vm8 = vweird.f32 %v1441_v57 }
 0x35e   :  { %v318_v63 = vmul.f32 %v1443_v61, %v316_v58  ;;  %vm241_vm10 = vmor %vm239_vm9, %vm240_vm8  ;;  %vm323_vm12 = vweird.f32 %v1443_v61 }
 0x35f   :  { %v236_v60 = vsub.f32 1.0, %v235_v59  ;;  %vm324_vm14 = vmor %vm322_vm13, %vm323_vm12 }
 0x360   :  { %v319_v3 = vsub.f32 1.0, %v318_v63 }
 0x361   :  { %v237_v62 = vmul.f32 %v1441_v57, %v236_v60 }
 0x362   :  { %v320_v8 = vmul.f32 %v1443_v61, %v319_v3 }
 0x363   :  { %v238_v0 = vadd.f32 %v1441_v57, %v237_v62 }
 0x364   :  { %v321_v12 = vadd.f32 %v1443_v61, %v320_v8 }
 0x365   :  { %v242_v4 = vsel %vm241_vm10, %v1441_v57, %v238_v0 }
 0x366   :  { %v247_v10 = vsel %vm244_vm11, %v246_v6, %v242_v4  ;;  %v325_v15 = vsel %vm324_vm14, %v1443_v61, %v321_v12 }
 0x367   :  { %v330_v18 = vsel %vm327_vm15, %v329_v16, %v325_v15  ;;  %v250_v20 = vmul.f32 0.0, %v247_v10 }
 0x368   :  { %v333_v24 = vmul.f32 %v330_v18, %v1618_v28  ;;  %v1695_v28 = vld [vmem:[#allocation2 + $0x38] sm:$0xff] }
 0x369   :  { %306 = vmatpush.msra.mxu3 %v1695_v28 }
 0x36b   :  { %307 = vmatpush.msra.mxu3 %v1698_v40 }
 0x36d   :  { %450 = vmatpush.msrb.mxu3 %v1690_v38 }
 0x36f   :  { %451 = vmatpush.msrb.mxu3 %v1692_v39 }
 0x371   :  { %452 = vmatpush.msrb.mxu3 %v1695_v28 }
 0x373   :  { %453 = vmatpush.msrb.mxu3 %v1698_v40 }
 0x3bb   :  { %v253_v9 = vpop.permute.xlu0 %252 }
 0x3bc   :  { %v255_v11 = vmul.f32 %v253_v9, %v247_v10 }
 0x3be   :  { %257 = vrot.lane.b32.xlu2 %v255_v11, %s1589_s18 }
 0x3c5   :  { %v336_v17 = vpop.permute.xlu1 %335 }
 0x3c6   :  { %v338_v19 = vmul.f32 %v336_v17, %v330_v18 }
 0x3c8   :  { %340 = vrot.lane.b32.xlu0 %v338_v19, %s1589_s18 }
 0x418   :  { %v258_v21 = vpop.permute.xlu2 %257 }
 0x419   :  { %v1678_v22 = vadd.f32 %v258_v21, %v250_v20 }
 0x41b   :  { %1444 = vtanh.f32 %v1678_v22 }
 0x421   :  { %v1445_v23 = vpop.eup %1444 }
 0x422   :  { %263 = vrot.lane.b32.xlu1 %v1445_v23, %s1588_s1 }
 0x43a   :  { %v341_v25 = vpop.permute.xlu0 %340 }
 0x43b   :  { %v1683_v26 = vadd.f32 %v341_v25, %v333_v24 }
 0x43d   :  { %1446 = vtanh.f32 %v1683_v26 }
 0x443   :  { %v1447_v27 = vpop.eup %1446 }
 0x444   :  { %346 = vrot.lane.b32.xlu2 %v1447_v27, %s1588_s1 }
 0x44c   :  { %44 = vperm.xlu2 %1420, %v29_v29  }
 0x494   :  { %v264_v41 = vpop.permute.xlu1 %263 }
 0x495   :  { %v266_v42 = vmul.f32 %v264_v41, %v247_v10 }
 0x497   :  { %288 = vrot.lane.b32.xlu0 %v266_v42, %s1589_s18 }
 0x49e   :  { %v347_v43 = vpop.permute.xlu2 %346 }
 0x49f   :  { %v349_v45 = vmul.f32 %v347_v43, %v330_v18 }
 0x4a1   :  { %351 = vrot.lane.b32.xlu1 %v349_v45, %s1589_s18 }
 0x4a6   :  { %v45_v46 = vpop.permute.xlu2 %44 }
 0x4a7   :  { %vm63_vm1 = vcmp.eq.s32.totalorder %v45_v46, %v1611_v5 }
 0x4a8   :  { %v1358_v47 = vsel %vm63_vm1, 1.0, %v1587_v7 }
 0x4a9   :  { %1366 = vmatmul.msk.f32.gmra.mxu0 %vm87_vm0, %v1358_v47 }
 0x509   :  { %v289_v48 = vpop.permute.xlu0 %288 }
 0x50a   :  { %1376 = vmatmul.msk.f32.vlgmr.msra.gmra.mxu3 %vm207_vm6, %v289_v48 }
 0x50b   :  { %596 = vmatpush.msra.mxu3 %v1690_v38 }
 0x50d   :  { %597 = vmatpush.msra.mxu3 %v1692_v39 }
 0x50f   :  { %598 = vmatpush.msra.mxu3 %v1695_v28 }
 0x511   :  { %599 = vmatpush.msra.mxu3 %v1698_v40 }
 0x513   :  { %v352_v49 = vpop.permute.xlu1 %351 }
 0x514   :  { %1378 = vmatmul.msk.f32.vlgmr.msrb.gmra.mxu1 %vm207_vm6, %v352_v49  ;;  %1380 = vmatmul.msk.f32.vlgmr.msrb.gmra.mxu2 %vm207_vm6, %v352_v49 }
 0x515   :  { %659 = vmatpush.msrb.mxu1 %v1622_v30  ;;  %717 = vmatpush.msrb.mxu2 %v1624_v31 }
 0x517   :  { %660 = vmatpush.msrb.mxu1 %v1626_v32  ;;  %718 = vmatpush.msrb.mxu2 %v1630_v33 }
 0x519   :  { %661 = vmatpush.msrb.mxu1 %v1632_v34  ;;  %719 = vmatpush.msrb.mxu2 %v1634_v35 }
 0x51b   :  { %662 = vmatpush.msrb.mxu1 %v1638_v36  ;;  %720 = vmatpush.msrb.mxu2 %v1640_v37 }
 0x526   :  { %v135_v54 = vpop.f32.mrf.mxu0 }
 0x58d   :  { %v309_v50 = vpop.f32.mrf.mxu3 }
 0x591   :  { %v372_v51 = vpop.f32.mrf.mxu1 }
 0x592   :  { %v373_v52 = vadd.f32 %v372_v51, %v309_v50 }
 0x594   :  { %v375_v53 = vadd.f32 %v1671_v44, %v373_v52 }
 0x596   :  { %1448 = vtanh.f32 %v375_v53  ;;  %v1379_v59 = vmul.f32 -1.442695, %v375_v53 }
 0x597   :  { %v430_v55 = vpop.f32.mrf.mxu2 }
 0x598   :  { %v458_v56 = vadd.f32 %v430_v55, %v135_v54 }
 0x59a   :  { %1450 = vtanh.f32 %v458_v56  ;;  %v1382_v60 = vmul.f32 -1.442695, %v458_v56 }
 0x59b   :  { %1452 = vpow2.f32 %v1379_v59 }
 0x59c   :  { %v1449_v57 = vpop.eup %1448  ;;  %1454 = vpow2.f32 %v1382_v60 }
 0x59d   :  { %398 = vrot.lane.b32.xlu0 %v1449_v57, %s1588_s1 }
 0x5a0   :  { %v1451_v58 = vpop.eup %1450 }
 0x5a1   :  { %481 = vrot.lane.b32.xlu1 %v1451_v58, %s1588_s1  ;;  %v1453_v61 = vpop.eup %1452 }
 0x5a2   :  { %v379_v62 = vadd.f32 1.0, %v1453_v61  ;;  %v1455_v63 = vpop.eup %1454 }
 0x5a3   :  { %v462_v0 = vadd.f32 1.0, %v1455_v63 }
 0x5a4   :  { %1456 = vrcp.f32 %v379_v62  ;;  %v391_v12 = vand.u32 2147483648, %v379_v62  ;;  %vm385_vm3 = vweird.f32 %v379_v62  ;;  %v389_v13 = vand.u32 2147483647, %v379_v62 }
 0x5a5   :  { %1458 = vrcp.f32 %v462_v0  ;;  %v474_v17 = vand.u32 2147483648, %v462_v0  ;;  %vm468_vm8 = vweird.f32 %v462_v0  ;;  %v472_v18 = vand.u32 2147483647, %v462_v0 }
 0x5a6   :  { %v392_v16 = vor.u32 1.1754944e-38, %v391_v12  ;;  %vm390_vm7 = vcmp.eq.f32.partialorder %v389_v13, 8.507059e+37 }
 0x5a7   :  { %v475_v24 = vor.u32 1.1754944e-38, %v474_v17  ;;  %vm473_vm10 = vcmp.eq.f32.partialorder %v472_v18, 8.507059e+37 }
 0x5aa   :  { %v1457_v1 = vpop.eup %1456 }
 0x5ab   :  { %v381_v2 = vmul.f32 %v1457_v1, %v379_v62  ;;  %v1459_v3 = vpop.eup %1458  ;;  %vm386_vm2 = vweird.f32 %v1457_v1 }
 0x5ac   :  { %v464_v6 = vmul.f32 %v1459_v3, %v462_v0  ;;  %vm387_vm4 = vmor %vm385_vm3, %vm386_vm2  ;;  %vm469_vm5 = vweird.f32 %v1459_v3 }
 0x5ad   :  { %v382_v4 = vsub.f32 1.0, %v381_v2  ;;  %vm470_vm9 = vmor %vm468_vm8, %vm469_vm5 }
 0x5ae   :  { %v465_v9 = vsub.f32 1.0, %v464_v6 }
 0x5af   :  { %v383_v8 = vmul.f32 %v1457_v1, %v382_v4 }
 0x5b0   :  { %v466_v11 = vmul.f32 %v1459_v3, %v465_v9 }
 0x5b1   :  { %v384_v10 = vadd.f32 %v1457_v1, %v383_v8 }
 0x5b2   :  { %v467_v15 = vadd.f32 %v1459_v3, %v466_v11 }
 0x5b3   :  { %v388_v14 = vsel %vm387_vm4, %v1457_v1, %v384_v10 }
 0x5b4   :  { %v393_v20 = vsel %vm390_vm7, %v392_v16, %v388_v14  ;;  %v471_v23 = vsel %vm470_vm9, %v1459_v3, %v467_v15 }
 0x5b5   :  { %v476_v27 = vsel %vm473_vm10, %v475_v24, %v471_v23  ;;  %v396_v41 = vmul.f32 %v393_v20, %v1678_v22  ;;  %v30_v22 = vld [vmem:[%s1921_s0 + $0x18] sm:$0xff] }
 0x5b6   :  { %v479_v46 = vmul.f32 %v476_v27, %v1683_v26 }
 0x60f   :  { %v399_v19 = vpop.permute.xlu0 %398 }
 0x610   :  { %v401_v21 = vmul.f32 %v399_v19, %v393_v20 }
 0x612   :  { %403 = vrot.lane.b32.xlu2 %v401_v21, %s1589_s18 }
 0x613   :  { %v482_v25 = vpop.permute.xlu1 %481 }
 0x614   :  { %v484_v29 = vmul.f32 %v482_v25, %v476_v27 }
 0x616   :  { %486 = vrot.lane.b32.xlu0 %v484_v29, %s1589_s18 }
 0x66c   :  { %v404_v42 = vpop.permute.xlu2 %403 }
 0x66d   :  { %v1732_v43 = vadd.f32 %v404_v42, %v396_v41 }
 0x66f   :  { %1460 = vtanh.f32 %v1732_v43 }
 0x675   :  { %v1461_v45 = vpop.eup %1460 }
 0x676   :  { %409 = vrot.lane.b32.xlu1 %v1461_v45, %s1588_s1 }
 0x688   :  { %v487_v47 = vpop.permute.xlu0 %486 }
 0x689   :  { %v1737_v48 = vadd.f32 %v487_v47, %v479_v46 }
 0x68b   :  { %1462 = vtanh.f32 %v1737_v48 }
 0x691   :  { %v1463_v49 = vpop.eup %1462 }
 0x692   :  { %492 = vrot.lane.b32.xlu2 %v1463_v49, %s1588_s1 }
 0x69a   :  { %47 = vperm.xlu2 %1420, %v30_v22  }
 0x6e8   :  { %v410_v50 = vpop.permute.xlu1 %409 }
 0x6e9   :  { %v412_v51 = vmul.f32 %v410_v50, %v393_v20 }
 0x6eb   :  { %434 = vrot.lane.b32.xlu0 %v412_v51, %s1589_s18 }
 0x6ec   :  { %v493_v52 = vpop.permute.xlu2 %492 }
 0x6ed   :  { %v495_v53 = vmul.f32 %v493_v52, %v476_v27 }
 0x6ef   :  { %497 = vrot.lane.b32.xlu1 %v495_v53, %s1589_s18 }
 0x6f4   :  { %v48_v26 = vpop.permute.xlu2 %47 }
 0x6f5   :  { %vm64_vm11 = vcmp.eq.s32.totalorder %v48_v26, %v1611_v5 }
 0x6f6   :  { %v1359_v54 = vsel %vm64_vm11, 1.0, %v1587_v7 }
 0x6f7   :  { %1367 = vmatmul.msk.f32.gmra.mxu0 %vm87_vm0, %v1359_v54 }
 0x75d   :  { %v435_v55 = vpop.permute.xlu0 %434 }
 0x75e   :  { %1381 = vmatmul.msk.f32.vlgmr.msrb.gmra.mxu3 %vm207_vm6, %v435_v55 }
 0x75f   :  { %742 = vmatpush.msrb.mxu3 %v1690_v38 }
 0x761   :  { %v498_v56 = vpop.permute.xlu1 %497  ;;  %743 = vmatpush.msrb.mxu3 %v1692_v39 }
 0x762   :  { %1383 = vmatmul.msk.f32.vlgmr.msra.gmra.mxu1 %vm207_vm6, %v498_v56  ;;  %1385 = vmatmul.msk.f32.vlgmr.msra.gmra.mxu2 %vm207_vm6, %v498_v56 }
 0x763   :  { %805 = vmatpush.msra.mxu1 %v1622_v30  ;;  %863 = vmatpush.msra.mxu2 %v1624_v31 }
 0x764   :  { %744 = vmatpush.msrb.mxu3 %v1695_v28 }
 0x765   :  { %806 = vmatpush.msra.mxu1 %v1626_v32  ;;  %864 = vmatpush.msra.mxu2 %v1630_v33 }
 0x766   :  { %745 = vmatpush.msrb.mxu3 %v1698_v40 }
 0x767   :  { %807 = vmatpush.msra.mxu1 %v1632_v34  ;;  %865 = vmatpush.msra.mxu2 %v1634_v35 }
 0x769   :  { %808 = vmatpush.msra.mxu1 %v1638_v36  ;;  %866 = vmatpush.msra.mxu2 %v1640_v37 }
 0x774   :  { %v138_v61 = vpop.f32.mrf.mxu0 }
 0x7df   :  { %v518_v57 = vpop.f32.mrf.mxu1 }
 0x7e1   :  { %v455_v58 = vpop.f32.mrf.mxu3 }
 0x7e2   :  { %v519_v59 = vadd.f32 %v518_v57, %v455_v58 }
 0x7e4   :  { %v521_v60 = vadd.f32 %v1671_v44, %v519_v59 }
 0x7e5   :  { %v576_v62 = vpop.f32.mrf.mxu2 }
 0x7e6   :  { %1464 = vtanh.f32 %v521_v60  ;;  %v604_v63 = vadd.f32 %v576_v62, %v138_v61  ;;  %v1384_v2 = vmul.f32 -1.442695, %v521_v60 }
 0x7e8   :  { %1466 = vtanh.f32 %v604_v63  ;;  %v1387_v3 = vmul.f32 -1.442695, %v604_v63 }
 0x7e9   :  { %1468 = vpow2.f32 %v1384_v2 }
 0x7ea   :  { %1470 = vpow2.f32 %v1387_v3 }
 0x7ec   :  { %v1465_v0 = vpop.eup %1464 }
 0x7ed   :  { %544 = vrot.lane.b32.xlu0 %v1465_v0, %s1588_s1 }
 0x7ee   :  { %v1467_v1 = vpop.eup %1466 }
 0x7ef   :  { %627 = vrot.lane.b32.xlu1 %v1467_v1, %s1588_s1  ;;  %v1469_v4 = vpop.eup %1468 }
 0x7f0   :  { %v1471_v6 = vpop.eup %1470  ;;  %v525_v8 = vadd.f32 1.0, %v1469_v4 }
 0x7f1   :  { %v608_v9 = vadd.f32 1.0, %v1471_v6 }
 0x7f2   :  { %1472 = vrcp.f32 %v525_v8  ;;  %v537_v19 = vand.u32 2147483648, %v525_v8  ;;  %vm531_vm13 = vweird.f32 %v525_v8  ;;  %v535_v20 = vand.u32 2147483647, %v525_v8 }
 0x7f3   :  { %1474 = vrcp.f32 %v608_v9  ;;  %v620_v24 = vand.u32 2147483648, %v608_v9  ;;  %vm614_vm1 = vweird.f32 %v608_v9  ;;  %v618_v27 = vand.u32 2147483647, %v608_v9 }
 0x7f4   :  { %v538_v25 = vor.u32 1.1754944e-38, %v537_v19  ;;  %vm536_vm2 = vcmp.eq.f32.partialorder %v535_v20, 8.507059e+37 }
 0x7f5   :  { %v621_v46 = vor.u32 1.1754944e-38, %v620_v24  ;;  %vm619_vm4 = vcmp.eq.f32.partialorder %v618_v27, 8.507059e+37 }
 0x7f8   :  { %v1473_v10 = vpop.eup %1472 }
 0x7f9   :  { %v1475_v11 = vpop.eup %1474  ;;  %v527_v12 = vmul.f32 %v1473_v10, %v525_v8  ;;  %vm532_vm12 = vweird.f32 %v1473_v10 }
 0x7fa   :  { %v610_v13 = vmul.f32 %v1475_v11, %v608_v9  ;;  %vm533_vm14 = vmor %vm531_vm13, %vm532_vm12  ;;  %vm615_vm15 = vweird.f32 %v1475_v11 }
 0x7fb   :  { %v528_v14 = vsub.f32 1.0, %v527_v12  ;;  %vm616_vm3 = vmor %vm614_vm1, %vm615_vm15 }
 0x7fc   :  { %v611_v15 = vsub.f32 1.0, %v610_v13 }
 0x7fd   :  { %v529_v16 = vmul.f32 %v1473_v10, %v528_v14 }
 0x7fe   :  { %v612_v17 = vmul.f32 %v1475_v11, %v611_v15 }
 0x7ff   :  { %v530_v18 = vadd.f32 %v1473_v10, %v529_v16 }
 0x800   :  { %v613_v21 = vadd.f32 %v1475_v11, %v612_v17 }
 0x801   :  { %v534_v23 = vsel %vm533_vm14, %v1473_v10, %v530_v18 }
 0x802   :  { %v539_v41 = vsel %vm536_vm2, %v538_v25, %v534_v23  ;;  %v617_v42 = vsel %vm616_vm3, %v1475_v11, %v613_v21 }
 0x803   :  { %v622_v49 = vsel %vm619_vm4, %v621_v46, %v617_v42  ;;  %v542_v50 = vmul.f32 %v539_v41, %v1732_v43  ;;  %v31_v43 = vld [vmem:[%s1921_s0 + $0x20] sm:$0xff] }
 0x804   :  { %v625_v26 = vmul.f32 %v622_v49, %v1737_v48 }
 0x85f   :  { %v545_v29 = vpop.permute.xlu0 %544 }
 0x860   :  { %v547_v45 = vmul.f32 %v545_v29, %v539_v41 }
 0x861   :  { %v628_v47 = vpop.permute.xlu1 %627 }
 0x862   :  { %549 = vrot.lane.b32.xlu2 %v547_v45, %s1589_s18  ;;  %v630_v22 = vmul.f32 %v628_v47, %v622_v49 }
 0x864   :  { %632 = vrot.lane.b32.xlu0 %v630_v22, %s1589_s18 }
 0x8bc   :  { %v550_v51 = vpop.permute.xlu2 %549 }
 0x8bd   :  { %v1770_v52 = vadd.f32 %v550_v51, %v542_v50 }
 0x8bf   :  { %1476 = vtanh.f32 %v1770_v52 }
 0x8c5   :  { %v1477_v53 = vpop.eup %1476 }
 0x8c6   :  { %555 = vrot.lane.b32.xlu1 %v1477_v53, %s1588_s1 }
 0x8d6   :  { %v633_v54 = vpop.permute.xlu0 %632 }
 0x8d7   :  { %v1775_v55 = vadd.f32 %v633_v54, %v625_v26 }
 0x8d9   :  { %1478 = vtanh.f32 %v1775_v55 }
 0x8df   :  { %v1479_v56 = vpop.eup %1478 }
 0x8e0   :  { %638 = vrot.lane.b32.xlu2 %v1479_v56, %s1588_s1 }
 0x8e8   :  { %50 = vperm.xlu2 %1420, %v31_v43  }
 0x938   :  { %v556_v57 = vpop.permute.xlu1 %555 }
 0x939   :  { %v558_v58 = vmul.f32 %v556_v57, %v539_v41 }
 0x93a   :  { %v639_v59 = vpop.permute.xlu2 %638 }
 0x93b   :  { %580 = vrot.lane.b32.xlu0 %v558_v58, %s1589_s18  ;;  %v641_v60 = vmul.f32 %v639_v59, %v622_v49 }
 0x93d   :  { %643 = vrot.lane.b32.xlu1 %v641_v60, %s1589_s18 }
 0x942   :  { %v51_v48 = vpop.permute.xlu2 %50 }
 0x943   :  { %vm65_vm5 = vcmp.eq.s32.totalorder %v51_v48, %v1611_v5 }
 0x944   :  { %v1360_v61 = vsel %vm65_vm5, 1.0, %v1587_v7 }
 0x945   :  { %1368 = vmatmul.msk.f32.gmra.mxu0 %vm87_vm0, %v1360_v61 }
 0x9ad   :  { %v581_v62 = vpop.permute.xlu0 %580 }
 0x9ae   :  { %1386 = vmatmul.msk.f32.vlgmr.msra.gmra.mxu3 %vm207_vm6, %v581_v62 }
 0x9af   :  { %888 = vmatpush.msra.mxu3 %v1690_v38  ;;  %v644_v63 = vpop.permute.xlu1 %643 }
 0x9b0   :  { %1388 = vmatmul.msk.f32.vlgmr.msrb.gmra.mxu1 %vm207_vm6, %v644_v63  ;;  %1390 = vmatmul.msk.f32.vlgmr.msrb.gmra.mxu2 %vm207_vm6, %v644_v63 }
 0x9b1   :  { %951 = vmatpush.msrb.mxu1 %v1622_v30  ;;  %1009 = vmatpush.msrb.mxu2 %v1624_v31 }
 0x9b2   :  { %889 = vmatpush.msra.mxu3 %v1692_v39 }
 0x9b3   :  { %952 = vmatpush.msrb.mxu1 %v1626_v32  ;;  %1010 = vmatpush.msrb.mxu2 %v1630_v33 }
 0x9b4   :  { %890 = vmatpush.msra.mxu3 %v1695_v28 }
 0x9b5   :  { %953 = vmatpush.msrb.mxu1 %v1632_v34  ;;  %1011 = vmatpush.msrb.mxu2 %v1634_v35 }
 0x9b6   :  { %891 = vmatpush.msra.mxu3 %v1698_v40 }
 0x9b7   :  { %954 = vmatpush.msrb.mxu1 %v1638_v36  ;;  %1012 = vmatpush.msrb.mxu2 %v1640_v37 }
 0x9c2   :  { %v141_v3 = vpop.f32.mrf.mxu0 }
 0xa2d   :  { %v664_v0 = vpop.f32.mrf.mxu1 }
 0xa31   :  { %v601_v1 = vpop.f32.mrf.mxu3 }
 0xa32   :  { %v665_v2 = vadd.f32 %v664_v0, %v601_v1 }
 0xa33   :  { %v722_v6 = vpop.f32.mrf.mxu2 }
 0xa34   :  { %v667_v4 = vadd.f32 %v1671_v44, %v665_v2  ;;  %v750_v8 = vadd.f32 %v722_v6, %v141_v3 }
 0xa36   :  { %1480 = vtanh.f32 %v667_v4  ;;  %v1389_v11 = vmul.f32 -1.442695, %v667_v4  ;;  %v1392_v12 = vmul.f32 -1.442695, %v750_v8 }
 0xa37   :  { %1482 = vtanh.f32 %v750_v8 }
 0xa38   :  { %1484 = vpow2.f32 %v1389_v11 }
 0xa39   :  { %1486 = vpow2.f32 %v1392_v12 }
 0xa3c   :  { %v1481_v9 = vpop.eup %1480 }
 0xa3d   :  { %v1483_v10 = vpop.eup %1482  ;;  %690 = vrot.lane.b32.xlu0 %v1481_v9, %s1588_s1 }
 0xa3e   :  { %773 = vrot.lane.b32.xlu1 %v1483_v10, %s1588_s1  ;;  %v1485_v13 = vpop.eup %1484 }
 0xa3f   :  { %v1487_v14 = vpop.eup %1486  ;;  %v671_v15 = vadd.f32 1.0, %v1485_v13 }
 0xa40   :  { %v754_v16 = vadd.f32 1.0, %v1487_v14 }
 0xa41   :  { %1488 = vrcp.f32 %v671_v15  ;;  %v683_v29 = vand.u32 2147483648, %v671_v15  ;;  %vm677_vm9 = vweird.f32 %v671_v15  ;;  %v681_v42 = vand.u32 2147483647, %v671_v15 }
 0xa42   :  { %1490 = vrcp.f32 %v754_v16  ;;  %v766_v45 = vand.u32 2147483648, %v754_v16  ;;  %vm760_vm11 = vweird.f32 %v754_v16  ;;  %v764_v46 = vand.u32 2147483647, %v754_v16 }
 0xa43   :  { %v684_v49 = vor.u32 1.1754944e-38, %v683_v29  ;;  %vm682_vm13 = vcmp.eq.f32.partialorder %v681_v42, 8.507059e+37 }
 0xa44   :  { %v767_v50 = vor.u32 1.1754944e-38, %v766_v45  ;;  %vm765_vm14 = vcmp.eq.f32.partialorder %v764_v46, 8.507059e+37 }
 0xa47   :  { %v1489_v17 = vpop.eup %1488 }
 0xa48   :  { %v1491_v18 = vpop.eup %1490  ;;  %v673_v19 = vmul.f32 %v1489_v17, %v671_v15  ;;  %vm678_vm7 = vweird.f32 %v1489_v17 }
 0xa49   :  { %v756_v20 = vmul.f32 %v1491_v18, %v754_v16  ;;  %vm761_vm8 = vweird.f32 %v1491_v18  ;;  %vm679_vm10 = vmor %vm677_vm9, %vm678_vm7 }
 0xa4a   :  { %v674_v21 = vsub.f32 1.0, %v673_v19  ;;  %vm762_vm12 = vmor %vm760_vm11, %vm761_vm8 }
 0xa4b   :  { %v757_v23 = vsub.f32 1.0, %v756_v20 }
 0xa4c   :  { %v675_v24 = vmul.f32 %v1489_v17, %v674_v21 }
 0xa4d   :  { %v758_v25 = vmul.f32 %v1491_v18, %v757_v23 }
 0xa4e   :  { %v676_v27 = vadd.f32 %v1489_v17, %v675_v24 }
 0xa4f   :  { %v759_v41 = vadd.f32 %v1491_v18, %v758_v25 }
 0xa50   :  { %v680_v47 = vsel %vm679_vm10, %v1489_v17, %v676_v27 }
 0xa51   :  { %v763_v22 = vsel %vm762_vm12, %v1491_v18, %v759_v41  ;;  %v685_v53 = vsel %vm682_vm13, %v684_v49, %v680_v47 }
 0xa52   :  { %v768_v56 = vsel %vm765_vm14, %v767_v50, %v763_v22  ;;  %v688_v57 = vmul.f32 %v685_v53, %v1770_v52  ;;  %v32_v52 = vld [vmem:[%s1921_s0 + $0x28] sm:$0xff] }
 0xa53   :  { %v771_v48 = vmul.f32 %v768_v56, %v1775_v55 }
 0xaaf   :  { %v691_v51 = vpop.permute.xlu0 %690 }
 0xab0   :  { %v693_v26 = vmul.f32 %v691_v51, %v685_v53  ;;  %v774_v54 = vpop.permute.xlu1 %773 }
 0xab1   :  { %v776_v43 = vmul.f32 %v774_v54, %v768_v56 }
 0xab2   :  { %695 = vrot.lane.b32.xlu2 %v693_v26, %s1589_s18 }
 0xab3   :  { %778 = vrot.lane.b32.xlu0 %v776_v43, %s1589_s18 }
 0xb0c   :  { %v696_v58 = vpop.permute.xlu2 %695 }
 0xb0d   :  { %v1808_v59 = vadd.f32 %v696_v58, %v688_v57 }
 0xb0f   :  { %1492 = vtanh.f32 %v1808_v59 }
 0xb15   :  { %v1493_v60 = vpop.eup %1492 }
 0xb16   :  { %701 = vrot.lane.b32.xlu1 %v1493_v60, %s1588_s1 }
 0xb25   :  { %v779_v61 = vpop.permute.xlu0 %778 }
 0xb26   :  { %v1813_v62 = vadd.f32 %v779_v61, %v771_v48 }
 0xb28   :  { %1494 = vtanh.f32 %v1813_v62 }
 0xb2e   :  { %v1495_v63 = vpop.eup %1494 }
 0xb2f   :  { %784 = vrot.lane.b32.xlu2 %v1495_v63, %s1588_s1 }
 0xb37   :  { %53 = vperm.xlu2 %1420, %v32_v52  }
 0xb88   :  { %v702_v0 = vpop.permute.xlu1 %701 }
 0xb89   :  { %v704_v1 = vmul.f32 %v702_v0, %v685_v53  ;;  %v785_v2 = vpop.permute.xlu2 %784 }
 0xb8a   :  { %v787_v3 = vmul.f32 %v785_v2, %v768_v56 }
 0xb8b   :  { %726 = vrot.lane.b32.xlu0 %v704_v1, %s1589_s18 }
 0xb8c   :  { %789 = vrot.lane.b32.xlu1 %v787_v3, %s1589_s18 }
 0xb91   :  { %v54_v55 = vpop.permute.xlu2 %53 }
 0xb92   :  { %vm66_vm15 = vcmp.eq.s32.totalorder %v54_v55, %v1611_v5 }
 0xb93   :  { %v1361_v4 = vsel %vm66_vm15, 1.0, %v1587_v7 }
 0xb94   :  { %1369 = vmatmul.msk.f32.gmra.mxu0 %vm87_vm0, %v1361_v4 }
 0xbfd   :  { %v727_v6 = vpop.permute.xlu0 %726 }
 0xbfe   :  { %v790_v8 = vpop.permute.xlu1 %789  ;;  %1391 = vmatmul.msk.f32.vlgmr.msrb.gmra.mxu3 %vm207_vm6, %v727_v6 }
 0xbff   :  { %1393 = vmatmul.msk.f32.vlgmr.msra.gmra.mxu1 %vm207_vm6, %v790_v8  ;;  %1395 = vmatmul.msk.f32.vlgmr.msra.gmra.mxu2 %vm207_vm6, %v790_v8  ;;  %v1552_v8 = vld [vmem:[#allocation2 + $0x68] sm:$0xff] }
 0xc00   :  { %1097 = vmatpush.msra.mxu1 %v1622_v30  ;;  %1155 = vmatpush.msra.mxu2 %v1624_v31 }
 0xc01   :  { %1034 = vmatpush.msrb.mxu3 %v1690_v38 }
 0xc02   :  { %1098 = vmatpush.msra.mxu1 %v1626_v32  ;;  %1156 = vmatpush.msra.mxu2 %v1630_v33 }
 0xc03   :  { %1035 = vmatpush.msrb.mxu3 %v1692_v39 }
 0xc04   :  { %1099 = vmatpush.msra.mxu1 %v1632_v34  ;;  %1157 = vmatpush.msra.mxu2 %v1634_v35 }
 0xc05   :  { %1036 = vmatpush.msrb.mxu3 %v1695_v28 }
 0xc06   :  { %1100 = vmatpush.msra.mxu1 %v1638_v36  ;;  %1158 = vmatpush.msra.mxu2 %v1640_v37 }
 0xc07   :  { %1037 = vmatpush.msrb.mxu3 %v1698_v40 }
 0xc11   :  { %v144_v9 = vpop.f32.mrf.mxu0 }
 0xc7c   :  { %v810_v30 = vpop.f32.mrf.mxu1 }
 0xc81   :  { %v747_v31 = vpop.f32.mrf.mxu3 }
 0xc82   :  { %v811_v32 = vadd.f32 %v810_v30, %v747_v31  ;;  %v868_v10 = vpop.f32.mrf.mxu2  ;;  %v1553_v30 = vld [vmem:[#allocation2 + $0x60] sm:$0xff]  ;;  %v1554_v31 = vld [vmem:[#allocation2 + $0x58] sm:$0xff] }
 0xc83   :  { %v896_v33 = vadd.f32 %v868_v10, %v144_v9  ;;  %v1555_v9 = vld [vmem:[#allocation2 + $0x50] sm:$0xff] }
 0xc84   :  { %v813_v11 = vadd.f32 %v1671_v44, %v811_v32 }
 0xc85   :  { %1496 = vtanh.f32 %v896_v33  ;;  %v1397_v36 = vmul.f32 -1.442695, %v896_v33 }
 0xc86   :  { %1498 = vtanh.f32 %v813_v11  ;;  %v1394_v37 = vmul.f32 -1.442695, %v813_v11 }
 0xc87   :  { %1500 = vpow2.f32 %v1397_v36 }
 0xc88   :  { %1502 = vpow2.f32 %v1394_v37 }
 0xc8b   :  { %v1497_v34 = vpop.eup %1496 }
 0xc8c   :  { %v1499_v35 = vpop.eup %1498  ;;  %919 = vrot.lane.b32.xlu1 %v1497_v34, %s1588_s1 }
 0xc8d   :  { %836 = vrot.lane.b32.xlu0 %v1499_v35, %s1588_s1  ;;  %v1501_v12 = vpop.eup %1500 }
 0xc8e   :  { %v1503_v13 = vpop.eup %1502  ;;  %v900_v14 = vadd.f32 1.0, %v1501_v12 }
 0xc8f   :  { %v817_v15 = vadd.f32 1.0, %v1503_v13 }
 0xc90   :  { %1504 = vrcp.f32 %v900_v14  ;;  %v912_v27 = vand.u32 2147483648, %v900_v14  ;;  %vm906_vm3 = vweird.f32 %v900_v14  ;;  %v910_v41 = vand.u32 2147483647, %v900_v14 }
 0xc91   :  { %1506 = vrcp.f32 %v817_v15  ;;  %v829_v42 = vand.u32 2147483648, %v817_v15  ;;  %vm823_vm5 = vweird.f32 %v817_v15  ;;  %v827_v45 = vand.u32 2147483647, %v817_v15 }
 0xc92   :  { %v913_v47 = vor.u32 1.1754944e-38, %v912_v27  ;;  %vm911_vm8 = vcmp.eq.f32.partialorder %v910_v41, 8.507059e+37 }
 0xc93   :  { %v830_v22 = vor.u32 1.1754944e-38, %v829_v42  ;;  %vm828_vm9 = vcmp.eq.f32.partialorder %v827_v45, 8.507059e+37 }
 0xc96   :  { %v1505_v16 = vpop.eup %1504 }
 0xc97   :  { %v1507_v17 = vpop.eup %1506  ;;  %v902_v18 = vmul.f32 %v1505_v16, %v900_v14  ;;  %vm907_vm1 = vweird.f32 %v1505_v16 }
 0xc98   :  { %v819_v19 = vmul.f32 %v1507_v17, %v817_v15  ;;  %vm824_vm2 = vweird.f32 %v1507_v17  ;;  %vm908_vm4 = vmor %vm906_vm3, %vm907_vm1 }
 0xc99   :  { %v903_v20 = vsub.f32 1.0, %v902_v18  ;;  %vm825_vm7 = vmor %vm823_vm5, %vm824_vm2 }
 0xc9a   :  { %v820_v21 = vsub.f32 1.0, %v819_v19 }
 0xc9b   :  { %v904_v23 = vmul.f32 %v1505_v16, %v903_v20 }
 0xc9c   :  { %v821_v24 = vmul.f32 %v1507_v17, %v820_v21 }
 0xc9d   :  { %v905_v25 = vadd.f32 %v1505_v16, %v904_v23 }
 0xc9e   :  { %v822_v29 = vadd.f32 %v1507_v17, %v821_v24 }
 0xc9f   :  { %v909_v46 = vsel %vm908_vm4, %v1505_v16, %v905_v25 }
 0xca0   :  { %v826_v49 = vsel %vm825_vm7, %v1507_v17, %v822_v29  ;;  %v914_v51 = vsel %vm911_vm8, %v913_v47, %v909_v46 }
 0xca1   :  { %v831_v54 = vsel %vm828_vm9, %v830_v22, %v826_v49  ;;  %v917_v48 = vmul.f32 %v914_v51, %v1813_v62 }
 0xca2   :  { %v834_v43 = vmul.f32 %v831_v54, %v1808_v59  ;;  %v33_v59 = vld [vmem:[%s1921_s0 + $0x30] sm:$0xff] }
 0xcfe   :  { %v920_v50 = vpop.permute.xlu1 %919 }
 0xcff   :  { %v922_v53 = vmul.f32 %v920_v50, %v914_v51  ;;  %v837_v26 = vpop.permute.xlu0 %836 }
 0xd00   :  { %v839_v56 = vmul.f32 %v837_v26, %v831_v54 }
 0xd01   :  { %924 = vrot.lane.b32.xlu0 %v922_v53, %s1589_s18 }
 0xd02   :  { %841 = vrot.lane.b32.xlu2 %v839_v56, %s1589_s18 }
 0xd5c   :  { %v842_v57 = vpop.permute.xlu2 %841 }
 0xd5d   :  { %v1846_v58 = vadd.f32 %v842_v57, %v834_v43 }
 0xd5f   :  { %1508 = vtanh.f32 %v1846_v58 }
 0xd65   :  { %v1509_v60 = vpop.eup %1508 }
 0xd66   :  { %847 = vrot.lane.b32.xlu1 %v1509_v60, %s1588_s1 }
 0xd73   :  { %v925_v61 = vpop.permute.xlu0 %924 }
 0xd74   :  { %v1851_v63 = vadd.f32 %v925_v61, %v917_v48 }
 0xd76   :  { %1510 = vtanh.f32 %v1851_v63 }
 0xd7c   :  { %v1511_v52 = vpop.eup %1510 }
 0xd7d   :  { %930 = vrot.lane.b32.xlu2 %v1511_v52, %s1588_s1 }
 0xd85   :  { %56 = vperm.xlu2 %1420, %v33_v59  }
 0xdd7   :  { %v931_v0 = vpop.permute.xlu2 %930 }
 0xdd8   :  { %v933_v1 = vmul.f32 %v931_v0, %v914_v51  ;;  %v848_v2 = vpop.permute.xlu1 %847 }
 0xdd9   :  { %v850_v3 = vmul.f32 %v848_v2, %v831_v54 }
 0xdda   :  { %935 = vrot.lane.b32.xlu1 %v933_v1, %s1589_s18 }
 0xddb   :  { %872 = vrot.lane.b32.xlu0 %v850_v3, %s1589_s18 }
 0xddf   :  { %v57_v62 = vpop.permute.xlu2 %56 }
 0xde0   :  { %vm67_vm10 = vcmp.eq.s32.totalorder %v57_v62, %v1611_v5 }
 0xde1   :  { %v1362_v55 = vsel %vm67_vm10, 1.0, %v1587_v7 }
 0xde2   :  { %1370 = vmatmul.msk.f32.gmra.mxu0 %vm87_vm0, %v1362_v55 }
 0xe4c   :  { %v936_v4 = vpop.permute.xlu1 %935 }
 0xe4d   :  { %1398 = vmatmul.msk.f32.vlgmr.msrb.gmra.mxu1 %vm207_vm6, %v936_v4  ;;  %1400 = vmatmul.msk.f32.vlgmr.msrb.gmra.mxu2 %vm207_vm6, %v936_v4  ;;  %v873_v6 = vpop.permute.xlu0 %872 }
 0xe4e   :  { %1396 = vmatmul.msk.f32.vlgmr.msra.gmra.mxu3 %vm207_vm6, %v873_v6  ;;  %1243 = vmatpush.msrb.mxu1 %v1552_v8 }
 0xe4f   :  { %1180 = vmatpush.msra.mxu3 %v1690_v38 }
 0xe50   :  { %1244 = vmatpush.msrb.mxu1 %v1553_v30 }
 0xe51   :  { %1181 = vmatpush.msra.mxu3 %v1692_v39 }
 0xe52   :  { %1245 = vmatpush.msrb.mxu1 %v1554_v31 }
 0xe53   :  { %1182 = vmatpush.msra.mxu3 %v1695_v28 }
 0xe54   :  { %1246 = vmatpush.msrb.mxu1 %v1555_v9 }
 0xe55   :  { %1183 = vmatpush.msra.mxu3 %v1698_v40 }
 0xe5f   :  { %v147_v32 = vpop.f32.mrf.mxu0 }
 0xeca   :  { %v956_v33 = vpop.f32.mrf.mxu1 }
 0xed0   :  { %v1014_v10 = vpop.f32.mrf.mxu2 }
 0xed1   :  { %v1042_v11 = vadd.f32 %v1014_v10, %v147_v32  ;;  %v893_v34 = vpop.f32.mrf.mxu3 }
 0xed2   :  { %v957_v35 = vadd.f32 %v956_v33, %v893_v34 }
 0xed3   :  { %1512 = vtanh.f32 %v1042_v11  ;;  %v1402_v28 = vmul.f32 -1.442695, %v1042_v11 }
 0xed4   :  { %v959_v38 = vadd.f32 %v1671_v44, %v957_v35 }
 0xed6   :  { %1514 = vtanh.f32 %v959_v38  ;;  %v1399_v37 = vmul.f32 -1.442695, %v959_v38 }
 0xed7   :  { %1516 = vpow2.f32 %v1402_v28 }
 0xed8   :  { %1518 = vpow2.f32 %v1399_v37 }
 0xed9   :  { %v1513_v36 = vpop.eup %1512 }
 0xeda   :  { %1065 = vrot.lane.b32.xlu1 %v1513_v36, %s1588_s1 }
 0xedc   :  { %v1515_v39 = vpop.eup %1514 }
 0xedd   :  { %982 = vrot.lane.b32.xlu0 %v1515_v39, %s1588_s1  ;;  %v1517_v40 = vpop.eup %1516 }
 0xede   :  { %v1519_v12 = vpop.eup %1518  ;;  %v1046_v13 = vadd.f32 1.0, %v1517_v40 }
 0xedf   :  { %v963_v14 = vadd.f32 1.0, %v1519_v12 }
 0xee0   :  { %1520 = vrcp.f32 %v1046_v13  ;;  %v1058_v24 = vand.u32 2147483648, %v1046_v13  ;;  %vm1052_vm12 = vweird.f32 %v1046_v13  ;;  %v1056_v25 = vand.u32 2147483647, %v1046_v13 }
 0xee1   :  { %1522 = vrcp.f32 %v963_v14  ;;  %v975_v41 = vand.u32 2147483648, %v963_v14  ;;  %vm969_vm15 = vweird.f32 %v963_v14  ;;  %v973_v45 = vand.u32 2147483647, %v963_v14 }
 0xee2   :  { %v1059_v42 = vor.u32 1.1754944e-38, %v1058_v24  ;;  %vm1057_vm1 = vcmp.eq.f32.partialorder %v1056_v25, 8.507059e+37 }
 0xee3   :  { %v976_v50 = vor.u32 1.1754944e-38, %v975_v41  ;;  %vm974_vm3 = vcmp.eq.f32.partialorder %v973_v45, 8.507059e+37 }
 0xee6   :  { %v1521_v15 = vpop.eup %1520 }
 0xee7   :  { %v1523_v16 = vpop.eup %1522  ;;  %v1048_v44 = vmul.f32 %v1521_v15, %v1046_v13  ;;  %vm1053_vm11 = vweird.f32 %v1521_v15 }
 0xee8   :  { %v965_v17 = vmul.f32 %v1523_v16, %v963_v14  ;;  %vm1054_vm13 = vmor %vm1052_vm12, %vm1053_vm11  ;;  %vm970_vm14 = vweird.f32 %v1523_v16 }
 0xee9   :  { %v1049_v18 = vsub.f32 1.0, %v1048_v44  ;;  %vm971_vm2 = vmor %vm969_vm15, %vm970_vm14 }
 0xeea   :  { %v966_v19 = vsub.f32 1.0, %v965_v17 }
 0xeeb   :  { %v1050_v20 = vmul.f32 %v1521_v15, %v1049_v18 }
 0xeec   :  { %v967_v21 = vmul.f32 %v1523_v16, %v966_v19 }
 0xeed   :  { %v1051_v23 = vadd.f32 %v1521_v15, %v1050_v20 }
 0xeee   :  { %v968_v27 = vadd.f32 %v1523_v16, %v967_v21 }
 0xeef   :  { %v1055_v29 = vsel %vm1054_vm13, %v1521_v15, %v1051_v23 }
 0xef0   :  { %v1060_v47 = vsel %vm1057_vm1, %v1059_v42, %v1055_v29  ;;  %v972_v49 = vsel %vm971_vm2, %v1523_v16, %v968_v27 }
 0xef1   :  { %v977_v53 = vsel %vm974_vm3, %v976_v50, %v972_v49  ;;  %v1063_v60 = vmul.f32 %v1060_v47, %v1851_v63 }
 0xef2   :  { %v980_v54 = vmul.f32 %v977_v53, %v1846_v58  ;;  %v34_v58 = vld [vmem:[%s1921_s0 + $0x38] sm:$0xff] }
 0xf4c   :  { %v1066_v46 = vpop.permute.xlu1 %1065 }
 0xf4d   :  { %v1068_v22 = vmul.f32 %v1066_v46, %v1060_v47 }
 0xf4f   :  { %1070 = vrot.lane.b32.xlu0 %v1068_v22, %s1589_s18  ;;  %v983_v51 = vpop.permute.xlu0 %982 }
 0xf50   :  { %v985_v26 = vmul.f32 %v983_v51, %v977_v53 }
 0xf52   :  { %987 = vrot.lane.b32.xlu2 %v985_v26, %s1589_s18 }
 0xfac   :  { %v988_v56 = vpop.permute.xlu2 %987 }
 0xfad   :  { %v1876_v43 = vadd.f32 %v988_v56, %v980_v54 }
 0xfaf   :  { %1524 = vtanh.f32 %v1876_v43 }
 0xfb5   :  { %v1525_v57 = vpop.eup %1524 }
 0xfb6   :  { %993 = vrot.lane.b32.xlu1 %v1525_v57, %s1588_s1 }
 0xfc1   :  { %v1071_v48 = vpop.permute.xlu0 %1070 }
 0xfc2   :  { %v1881_v61 = vadd.f32 %v1071_v48, %v1063_v60 }
 0xfc4   :  { %1526 = vtanh.f32 %v1881_v61 }
 0xfca   :  { %v1527_v52 = vpop.eup %1526 }
 0xfcb   :  { %1076 = vrot.lane.b32.xlu2 %v1527_v52, %s1588_s1 }
 0xfd3   :  { %59 = vperm.xlu2 %1420, %v34_v58  }
0x1025   :  { %v1077_v59 = vpop.permute.xlu2 %1076 }
0x1026   :  { %v1079_v0 = vmul.f32 %v1077_v59, %v1060_v47 }
0x1028   :  { %1081 = vrot.lane.b32.xlu1 %v1079_v0, %s1589_s18  ;;  %v994_v1 = vpop.permute.xlu1 %993 }
0x1029   :  { %v996_v2 = vmul.f32 %v994_v1, %v977_v53 }
0x102b   :  { %1018 = vrot.lane.b32.xlu0 %v996_v2, %s1589_s18 }
0x102d   :  { %v60_v63 = vpop.permute.xlu2 %59 }
0x102e   :  { %vm68_vm4 = vcmp.eq.s32.totalorder %v60_v63, %v1611_v5  ;;  %v1896_v5 = vld [vmem:[#allocation2 + $0x70] ss:$0 sm:$0xff] }
0x102f   :  { %v1363_v3 = vsel %vm68_vm4, 1.0, %v1587_v7 }
0x1030   :  { %1371 = vmatmul.msk.f32.gmra.mxu0 %vm87_vm0, %v1363_v3 }
0x109a   :  { %v1082_v62 = vpop.permute.xlu1 %1081 }
0x109b   :  { %1403 = vmatmul.msk.f32.vlgmr.msra.gmra.mxu1 %vm207_vm6, %v1082_v62  ;;  %1405 = vmatmul.msk.f32.vlgmr.msra.gmra.mxu2 %vm207_vm6, %v1082_v62 }
0x109d   :  { %v1019_v55 = vpop.permute.xlu0 %1018 }
0x109e   :  { %1401 = vmatmul.msk.f32.vlgmr.msrb.gmra.mxu3 %vm207_vm6, %v1019_v55 }
0x10ad   :  { %v150_v4 = vpop.f32.mrf.mxu0 }
0x1118   :  { %v1102_v30 = vpop.f32.mrf.mxu1 }
0x111e   :  { %v1160_v6 = vpop.f32.mrf.mxu2 }
0x111f   :  { %v1188_v8 = vadd.f32 %v1160_v6, %v150_v4 }
0x1121   :  { %1528 = vtanh.f32 %v1188_v8  ;;  %v1039_v31 = vpop.f32.mrf.mxu3  ;;  %v1407_v33 = vmul.f32 -1.442695, %v1188_v8 }
0x1122   :  { %v1103_v9 = vadd.f32 %v1102_v30, %v1039_v31 }
0x1124   :  { %v1105_v7 = vadd.f32 %v1896_v5, %v1103_v9 }
0x1126   :  { %1530 = vtanh.f32 %v1105_v7  ;;  %v1404_v11 = vmul.f32 -1.442695, %v1105_v7 }
0x1127   :  { %v1529_v32 = vpop.eup %1528  ;;  %1532 = vpow2.f32 %v1407_v33 }
0x1128   :  { %1211 = vrot.lane.b32.xlu1 %v1529_v32, %s1588_s1  ;;  %1534 = vpow2.f32 %v1404_v11 }
0x112c   :  { %v1531_v10 = vpop.eup %1530 }
0x112d   :  { %1128 = vrot.lane.b32.xlu0 %v1531_v10, %s1588_s1  ;;  %v1533_v34 = vpop.eup %1532 }
0x112e   :  { %v1192_v35 = vadd.f32 1.0, %v1533_v34  ;;  %v1535_v38 = vpop.eup %1534 }
0x112f   :  { %v1109_v36 = vadd.f32 1.0, %v1535_v38  ;;  %v1292_v38 = vld [vmem:[#allocation2 + $0x90] sm:$0xff] }
0x1130   :  { %1536 = vrcp.f32 %v1192_v35  ;;  %v1204_v16 = vand.u32 2147483648, %v1192_v35  ;;  %vm1198_vm5 = vweird.f32 %v1192_v35  ;;  %v1202_v17 = vand.u32 2147483647, %v1192_v35  ;;  %1317 = vmatpush.msrb.mxu2 %v1292_v38 }
0x1131   :  { %1538 = vrcp.f32 %v1109_v36  ;;  %v1121_v21 = vand.u32 2147483648, %v1109_v36  ;;  %vm1115_vm10 = vweird.f32 %v1109_v36  ;;  %v1119_v25 = vand.u32 2147483647, %v1109_v36 }
0x1132   :  { %v1205_v19 = vor.u32 1.1754944e-38, %v1204_v16  ;;  %vm1203_vm9 = vcmp.eq.f32.partialorder %v1202_v17, 8.507059e+37  ;;  %v1294_v16 = vld [vmem:[#allocation2 + $0xa0] sm:$0xff] }
0x1133   :  { %v1122_v41 = vor.u32 1.1754944e-38, %v1121_v21  ;;  %vm1120_vm12 = vcmp.eq.f32.partialorder %v1119_v25, 8.507059e+37 }
0x1136   :  { %v1537_v39 = vpop.eup %1536 }
0x1137   :  { %v1194_v28 = vmul.f32 %v1537_v39, %v1192_v35  ;;  %v1539_v37 = vpop.eup %1538  ;;  %vm1199_vm0 = vweird.f32 %v1537_v39 }
0x1138   :  { %v1111_v12 = vmul.f32 %v1539_v37, %v1109_v36  ;;  %vm1200_vm7 = vmor %vm1198_vm5, %vm1199_vm0  ;;  %vm1116_vm8 = vweird.f32 %v1539_v37  ;;  %v1291_v36 = vld [vmem:[#allocation2 + $0x88] sm:$0xff] }
0x1139   :  { %v1195_v40 = vsub.f32 1.0, %v1194_v28  ;;  %vm1117_vm11 = vmor %vm1115_vm10, %vm1116_vm8  ;;  %1318 = vmatpush.msrb.mxu2 %v1291_v36  ;;  %v1289_v28 = vld [vmem:[#allocation2 + $0x78] sm:$0xff] }
0x113a   :  { %v1112_v14 = vsub.f32 1.0, %v1111_v12  ;;  %v1297_v12 = vld [vmem:[#allocation2 + $0xb8] sm:$0xff] }
0x113b   :  { %v1196_v13 = vmul.f32 %v1537_v39, %v1195_v40  ;;  %1342 = vmatpush.msrb.mxu3 %v1297_v12 }
0x113c   :  { %v1113_v44 = vmul.f32 %v1539_v37, %v1112_v14 }
0x113d   :  { %v1197_v15 = vadd.f32 %v1537_v39, %v1196_v13  ;;  %v1296_v13 = vld [vmem:[#allocation2 + $0xb0] sm:$0xff] }
0x113e   :  { %v1114_v20 = vadd.f32 %v1539_v37, %v1113_v44  ;;  %1343 = vmatpush.msrb.mxu3 %v1296_v13  ;;  %v1422_v44 = vld [vmem:[#allocation2 + $0x98] ss:$0 sm:$0xff] }
0x113f   :  { %v1201_v18 = vsel %vm1200_vm7, %v1537_v39, %v1197_v15  ;;  %v1290_v39 = vld [vmem:[#allocation2 + $0x80] sm:$0xff]  ;;  %v1295_v15 = vld [vmem:[#allocation2 + $0xa8] sm:$0xff] }
0x1140   :  { %v1206_v24 = vsel %vm1203_vm9, %v1205_v19, %v1201_v18  ;;  %v1118_v29 = vsel %vm1117_vm11, %v1539_v37, %v1114_v20  ;;  %1319 = vmatpush.msrb.mxu2 %v1290_v39  ;;  %1344 = vmatpush.msrb.mxu3 %v1295_v15  ;;  %v1423_v20 = vld [vmem:[#allocation2 + $0xc0] ss:$0 sm:$0xff] }
0x1141   :  { %v1123_v45 = vsel %vm1120_vm12, %v1122_v41, %v1118_v29  ;;  %v1209_v51 = vmul.f32 %v1206_v24, %v1881_v61 }
0x1142   :  { %v1126_v47 = vmul.f32 %v1123_v45, %v1876_v43  ;;  %1320 = vmatpush.msrb.mxu2 %v1289_v28  ;;  %1345 = vmatpush.msrb.mxu3 %v1294_v16 }
0x119a   :  { %v1212_v23 = vpop.permute.xlu1 %1211 }
0x119b   :  { %v1214_v27 = vmul.f32 %v1212_v23, %v1206_v24 }
0x119d   :  { %1216 = vrot.lane.b32.xlu0 %v1214_v27, %s1589_s18 }
0x119f   :  { %v1129_v42 = vpop.permute.xlu0 %1128 }
0x11a0   :  { %v1131_v46 = vmul.f32 %v1129_v42, %v1123_v45 }
0x11a2   :  { %1133 = vrot.lane.b32.xlu2 %v1131_v46, %s1589_s18 }
0x11fc   :  { %v1134_v49 = vpop.permute.xlu2 %1133 }
0x11fd   :  { %v1136_v22 = vadd.f32 %v1134_v49, %v1126_v47 }
0x11ff   :  { %1540 = vtanh.f32 %v1136_v22 }
0x1205   :  { %v1541_v50 = vpop.eup %1540 }
0x1206   :  { %1139 = vrot.lane.b32.xlu1 %v1541_v50, %s1588_s1 }
0x120f   :  { %v1217_v53 = vpop.permute.xlu0 %1216 }
0x1210   :  { %v1219_v26 = vadd.f32 %v1217_v53, %v1209_v51 }
0x1212   :  { %1542 = vtanh.f32 %v1219_v26 }
0x1218   :  { %v1543_v54 = vpop.eup %1542 }
0x1219   :  { %1222 = vrot.lane.b32.xlu2 %v1543_v54, %s1588_s1 }
0x1273   :  { %v1223_v56 = vpop.permute.xlu2 %1222 }
0x1274   :  { %v1225_v57 = vmul.f32 %v1223_v56, %v1206_v24 }
0x1276   :  { %1227 = vrot.lane.b32.xlu1 %v1225_v57, %s1589_s18 }
0x1278   :  { %v1140_v60 = vpop.permute.xlu1 %1139 }
0x1279   :  { %v1142_v43 = vmul.f32 %v1140_v60, %v1123_v45 }
0x127b   :  { %1164 = vrot.lane.b32.xlu0 %v1142_v43, %s1589_s18 }
0x12e8   :  { %v1228_v48 = vpop.permute.xlu1 %1227 }
0x12e9   :  { %1408 = vmatmul.msk.f32.vlgmr.msrb.gmra.mxu1 %vm207_vm6, %v1228_v48 }
0x12ed   :  { %v1165_v52 = vpop.permute.xlu0 %1164 }
0x12ee   :  { %1406 = vmatmul.msk.f32.vlgmr.msra.gmra.mxu3 %vm207_vm6, %v1165_v52 }
0x1366   :  { %v1248_v61 = vpop.f32.mrf.mxu1 }
0x1371   :  { %v1185_v58 = vpop.f32.mrf.mxu3 }
0x1372   :  { %v1249_v59 = vadd.f32 %v1248_v61, %v1185_v58 }
0x1374   :  { %v1251_v0 = vadd.f32 %v1896_v5, %v1249_v59 }
0x1376   :  { %1544 = vtanh.f32 %v1251_v0  ;;  %v1409_v2 = vmul.f32 -1.442695, %v1251_v0 }
0x1378   :  { %1546 = vpow2.f32 %v1409_v2 }
0x137c   :  { %v1545_v1 = vpop.eup %1544 }
0x137d   :  { %1274 = vrot.lane.b32.xlu2 %v1545_v1, %s1588_s1 }
0x137e   :  { %v1547_v63 = vpop.eup %1546 }
0x137f   :  { %v1255_v3 = vadd.f32 1.0, %v1547_v63 }
0x1381   :  { %1548 = vrcp.f32 %v1255_v3  ;;  %v1267_v30 = vand.u32 2147483648, %v1255_v3  ;;  %vm1261_vm14 = vweird.f32 %v1255_v3  ;;  %v1265_v31 = vand.u32 2147483647, %v1255_v3 }
0x1383   :  { %v1268_v5 = vor.u32 1.1754944e-38, %v1267_v30  ;;  %vm1266_vm1 = vcmp.eq.f32.partialorder %v1265_v31, 8.507059e+37 }
0x1387   :  { %v1549_v62 = vpop.eup %1548 }
0x1388   :  { %v1257_v55 = vmul.f32 %v1549_v62, %v1255_v3  ;;  %vm1262_vm13 = vweird.f32 %v1549_v62 }
0x1389   :  { %vm1263_vm15 = vmor %vm1261_vm14, %vm1262_vm13 }
0x138a   :  { %v1258_v4 = vsub.f32 1.0, %v1257_v55 }
0x138c   :  { %v1259_v6 = vmul.f32 %v1549_v62, %v1258_v4 }
0x138e   :  { %v1260_v8 = vadd.f32 %v1549_v62, %v1259_v6 }
0x1390   :  { %v1264_v9 = vsel %vm1263_vm15, %v1549_v62, %v1260_v8 }
0x1391   :  { %v1269_v32 = vsel %vm1266_vm1, %v1268_v5, %v1264_v9 }
0x1392   :  { %v1272_v33 = vmul.f32 %v1269_v32, %v1136_v22 }
0x13d7   :  { %v1275_v7 = vpop.permute.xlu2 %1274 }
0x13d8   :  { %v1277_v10 = vmul.f32 %v1275_v7, %v1269_v32 }
0x13da   :  { %1279 = vrot.lane.b32.xlu0 %v1277_v10, %s1589_s18 }
0x144c   :  { %v1280_v11 = vpop.permute.xlu0 %1279 }
0x144d   :  { %v1282_v34 = vadd.f32 %v1280_v11, %v1272_v33 }
0x144f   :  { %1550 = vtanh.f32 %v1282_v34 }
0x1455   :  { %v1551_v35 = vpop.eup %1550 }
0x1456   :  { %1285 = vrot.lane.b32.xlu1 %v1551_v35, %s1588_s1 }
0x14c8   :  { %v1286_v37 = vpop.permute.xlu1 %1285 }
0x14c9   :  { %v1288_v40 = vmul.f32 %v1286_v37, %v1269_v32 }
0x14cb   :  { %1301 = vrot.lane.b32.xlu2 %v1288_v40, %s1589_s18 }
0x1525   :  { %v1302_v14 = vpop.permute.xlu2 %1301 }
0x1526   :  { %1410 = vmatmul.msk.f32.vlgmr.msrb.gmra.mxu2 %vm207_vm6, %v1302_v14 }
0x15a9   :  { %v1322_v17 = vpop.f32.mrf.mxu2 }
0x15aa   :  { %v1323_v18 = vadd.f32 %v1422_v44, %v1322_v17 }
0x15ac   :  { %v1325_v19 = vmax.f32 %v1323_v18, 0.0 }
0x15ae   :  { %1411 = vmatmul.msk.f32.vlgmr.msrb.gmra.mxu3 %vm207_vm6, %v1325_v19 }
0x1631   :  { %v1347_v21 = vpop.f32.mrf.mxu3 }
0x1632   :  { %v1348_v23 = vadd.f32 %v1423_v20, %v1347_v21 }
0x1634   :  { %1350 = vst [vmem:[%s1923_s2] sm:$0xff] %v1348_v23 }
0x1635   :  { %1355 = vsyncpa [#allocation3], 1 }

</bundles_post_ra>
